<compile_context>
chip_gen: v7x
topology: tpu7x:2x2x1
jax: 0.10.0
libtpu: 0.0.40
codegen_flags: <defaults>
</compile_context>

<pallas_src>
import math
from functools import partial

import jax
import jax.numpy as jnp
from jax.experimental import pallas as pl
from jax.experimental.pallas import tpu as pltpu


def mha_kernel(q_ref, k_ref, v_ref,
               wq_ref, bq_ref, wk_ref, bk_ref, wv_ref, bv_ref,
               wo_ref, bo_ref,
               o_ref,
               kproj_ref, vproj_ref, attn_ref,
               *, num_heads, d_k):
    # Grid = (B, S//tq); axis 1 (q-tiles) is innermost and "arbitrary" so the
    # K/V projection cached in VMEM scratch is valid for every q-tile of the
    # current batch element.
    i = pl.program_id(1)

    # ---- K/V projections: once per batch element, cached in VMEM scratch ----
    @pl.when(i == 0)
    def _():
        xk = k_ref[0]                                   # (S, D) bf16
        xv = v_ref[0]                                   # (S, D) bf16
        kproj_ref[...] = (jnp.dot(xk, wk_ref[...],
                                  preferred_element_type=jnp.float32)
                          + bk_ref[...]).astype(kproj_ref.dtype)
        vproj_ref[...] = (jnp.dot(xv, wv_ref[...],
                                  preferred_element_type=jnp.float32)
                          + bv_ref[...]).astype(vproj_ref.dtype)

    # ---- Q projection for this tile: one (tq, D) @ (D, D) matmul ----
    # 1/sqrt(d_k) is already folded into W_q / b_q by prepare_params().
    xq = q_ref[0]                                       # (tq, D) bf16
    qproj = (jnp.dot(xq, wq_ref[...], preferred_element_type=jnp.float32)
             + bq_ref[...]).astype(jnp.bfloat16)        # (tq, D)

    # ---- per-head attention; heads are static lane slices ----
    # TODO(synk): optional attention mask (mask == 0 -> -1e9) not wired in;
    # the reference forward defaults to mask=None.
    # TODO(synk): for very long S (esp. v7x 64 MiB VMEM) add a kv-tile grid
    # axis with an online-softmax (flash) accumulator instead of whole-S K/V.
    for h in range(num_heads):
        lo, hi = h * d_k, (h + 1) * d_k
        qh = qproj[:, lo:hi]                            # (tq, d_k) bf16
        kh = kproj_ref[:, lo:hi]                        # (S,  d_k) bf16
        vh = vproj_ref[:, lo:hi]                        # (S,  d_k) bf16

        # Scores: contract over d_k inside the MXU (no explicit transpose).
        scores = jax.lax.dot_general(
            qh, kh, dimension_numbers=(((1,), (1,)), ((), ())),
            preferred_element_type=jnp.float32)         # (tq, S) f32

        m = jnp.max(scores, axis=-1, keepdims=True)
        p = jnp.exp(scores - m)                         # unnormalized weights
        rs = jnp.sum(p, axis=-1, keepdims=True)         # (tq, 1)

        pv = jnp.dot(p.astype(jnp.bfloat16), vh,
                     preferred_element_type=jnp.float32)  # (tq, d_k) f32
        # Normalize after the PV matmul: (tq, d_k) scaling instead of (tq, S).
        head_out = pv * pl.reciprocal(rs, approx=True)

        attn_ref[:, lo:hi] = head_out.astype(attn_ref.dtype)

    # ---- one full-K output projection: (tq, D) @ (D, D) + b_o ----
    out = (jnp.dot(attn_ref[...], wo_ref[...],
                   preferred_element_type=jnp.float32) + bo_ref[...])
    o_ref[0] = out.astype(o_ref.dtype)


def prepare_params(params, num_heads, compute_dtype=jnp.bfloat16):
    """One-time parameter transform (call once, reuse across forward calls).

    Folds the 1/sqrt(d_k) attention scale into W_q / b_q and casts weights to
    the MXU compute dtype.  Weights stay unsplit (D, D); biases stay f32.
    """
    wq, bq, wk, bk, wv, bv, wo, bo = params
    D = wq.shape[0]
    assert D % num_heads == 0
    d_k = D // num_heads
    scale = 1.0 / math.sqrt(d_k)
    return ((wq * scale).astype(compute_dtype), (bq * scale).reshape(1, D),
            wk.astype(compute_dtype), bk.reshape(1, D).astype(jnp.float32),
            wv.astype(compute_dtype), bv.reshape(1, D).astype(jnp.float32),
            wo.astype(compute_dtype), bo.reshape(1, D).astype(jnp.float32))


def _pick_q_tile(S, q_tile):
    # Largest multiple-of-8 divisor of S that is <= q_tile; else the whole S.
    for t in range(min(q_tile, S), 7, -1):
        if t % 8 == 0 and S % t == 0:
            return t
    return S


def _vmem_cap_bytes():
    # Generation-aware VMEM capacity (v5e/v6e: 128 MiB, v7x: 64 MiB per TC).
    try:
        info = pltpu.get_tpu_info()
        cap = getattr(info, "vmem_capacity_bytes", None)
        if cap:
            return int(cap)
    except Exception:
        pass
    return 64 << 20  # conservative fallback (v7x per-TensorCore VMEM)


def multi_head_attention(q, k, v, prepared_params, *, num_heads, q_tile=128,
                         compute_dtype=jnp.bfloat16):
    """q, k, v: [B, S, D] float32.  Returns [B, S, D] float32."""
    B, S, D = q.shape
    assert D % num_heads == 0
    d_k = D // num_heads
    out_dtype = q.dtype

    (wq, bq, wk, bk, wv, bv, wo, bo) = prepared_params

    # bf16 activations feeding the MXU (f32 accumulation happens in-kernel).
    q_c = q.astype(compute_dtype)
    k_c = k.astype(compute_dtype)
    v_c = v.astype(compute_dtype)

    tq = _pick_q_tile(S, q_tile)

    q_spec = pl.BlockSpec((1, tq, D), lambda b, i: (b, i, 0))
    kv_spec = pl.BlockSpec((1, S, D), lambda b, i: (b, 0, 0))
    o_spec = pl.BlockSpec((1, tq, D), lambda b, i: (b, i, 0))
    # Whole-array VMEM residency for weights/biases (block never changes).
    vmem_full = pl.BlockSpec(memory_space=pltpu.MemorySpace.VMEM)

    # VMEM budget, capped generation-aware (leave ~16 MiB headroom).
    bytes_bf16, bytes_f32 = 2, 4
    weight_bytes = 4 * D * D * bytes_bf16 + 4 * D * bytes_f32
    block_bytes = (2 * tq * D * bytes_bf16          # q (double-buffered)
                   + 2 * 2 * S * D * bytes_bf16     # k, v (double-buffered)
                   + 2 * tq * D * bytes_f32)        # out (double-buffered)
    scratch_bytes = 2 * S * D * bytes_bf16 + tq * D * bytes_bf16
    temp_bytes = 6 * tq * max(S, D) * bytes_f32
    need = weight_bytes + block_bytes + scratch_bytes + temp_bytes + (4 << 20)
    cap = max(_vmem_cap_bytes() - (16 << 20), 16 << 20)
    vmem_limit = int(min(max(need, 32 << 20), cap))

    grid = (B, S // tq)

    return pl.pallas_call(
        partial(mha_kernel, num_heads=num_heads, d_k=d_k),
        out_shape=jax.ShapeDtypeStruct((B, S, D), out_dtype),
        grid_spec=pltpu.PrefetchScalarGridSpec(
            num_scalar_prefetch=0,
            grid=grid,
            in_specs=[q_spec, kv_spec, kv_spec,
                      vmem_full, vmem_full, vmem_full, vmem_full,
                      vmem_full, vmem_full, vmem_full, vmem_full],
            out_specs=o_spec,
            scratch_shapes=[
                pltpu.VMEM((S, D), compute_dtype),   # projected K cache
                pltpu.VMEM((S, D), compute_dtype),   # projected V cache
                pltpu.VMEM((tq, D), compute_dtype),  # concat(heads) for W_o
            ]),
        compiler_params=pltpu.CompilerParams(
            # q-tile axis must be sequential ("arbitrary") so the cached K/V
            # projections in scratch are valid; batch axis feeds both TCs.
            dimension_semantics=("parallel", "arbitrary"),
            vmem_limit_bytes=vmem_limit),
    )(q_c, k_c, v_c, wq, bq, wk, bk, wv, bv, wo, bo)


def reference_mha(q, k, v, params, *, num_heads):
    """Pure-JAX f32 reference mirroring the PyTorch forward exactly."""
    B, S, D = q.shape
    d_k = D // num_heads
    wq, bq, wk, bk, wv, bv, wo, bo = params

    def proj(x, w, b):
        return x @ w + b  # b is (1, D), broadcasts

    Q = proj(q, wq, bq).reshape(B, S, num_heads, d_k).transpose(0, 2, 1, 3)
    K = proj(k, wk, bk).reshape(B, S, num_heads, d_k).transpose(0, 2, 1, 3)
    V = proj(v, wv, bv).reshape(B, S, num_heads, d_k).transpose(0, 2, 1, 3)

    scores = jnp.einsum('bhqd,bhkd->bhqk', Q, K) / math.sqrt(d_k)
    w = jax.nn.softmax(scores, axis=-1)
    out = jnp.einsum('bhqk,bhkd->bhqd', w, V)
    out = out.transpose(0, 2, 1, 3).reshape(B, S, D)
    return out @ wo + bo


if __name__ == "__main__":
    # Lane/sublane friendly small shapes: D multiple of 128, S multiple of 16.
    B, S, D, H = 2, 16, 128, 4

    key = jax.random.PRNGKey(0)
    keys = jax.random.split(key, 11)

    # Deterministic synthetic parameters (nn.Linear(d_model, d_model) x4),
    # stored as (in, out) + (1, out); scale ~ Kaiming-uniform-ish.
    lim = 1.0 / math.sqrt(D)

    def init_w(k_):
        return jax.random.uniform(k_, (D, D), jnp.float32, -lim, lim)

    def init_b(k_):
        return jax.random.uniform(k_, (1, D), jnp.float32, -lim, lim)

    params = (init_w(keys[0]), init_b(keys[1]),   # W_q, b_q
              init_w(keys[2]), init_b(keys[3]),   # W_k, b_k
              init_w(keys[4]), init_b(keys[5]),   # W_v, b_v
              init_w(keys[6]), init_b(keys[7]))   # W_o, b_o

    q = jax.random.normal(keys[8], (B, S, D), jnp.float32)
    k = jax.random.normal(keys[9], (B, S, D), jnp.float32)
    v = jax.random.normal(keys[10], (B, S, D), jnp.float32)

    # One-time weight transform (scale fold + bf16 cast), reused across calls.
    prepared = prepare_params(params, num_heads=H)
    prepared = jax.block_until_ready(prepared)

    out = multi_head_attention(q, k, v, prepared, num_heads=H)
    out = jax.block_until_ready(out)

    ref = reference_mha(q, k, v, params, num_heads=H)
    assert out.shape == (B, S, D)
    # bf16 MXU operands (f32 accumulation) + approx reciprocal -> loosened
    # tolerance vs the f32 reference.
    assert jnp.allclose(out, ref, atol=3e-2, rtol=3e-2), "mismatch vs reference"

    print("KERNEL_OK")
</pallas_src>

<mosaic_0001>
module attributes {stable_mosaic.version = 11 : i64} {
  func.func @mha_kernel(%arg0: i32, %arg1: i32, %arg2: memref<1x16x128xbf16, #tpu.memory_space<vmem>>, %arg3: memref<1x16x128xbf16, #tpu.memory_space<vmem>>, %arg4: memref<1x16x128xbf16, #tpu.memory_space<vmem>>, %arg5: memref<128x128xbf16, #tpu.memory_space<vmem>>, %arg6: memref<1x128xf32, #tpu.memory_space<vmem>>, %arg7: memref<128x128xbf16, #tpu.memory_space<vmem>>, %arg8: memref<1x128xf32, #tpu.memory_space<vmem>>, %arg9: memref<128x128xbf16, #tpu.memory_space<vmem>>, %arg10: memref<1x128xf32, #tpu.memory_space<vmem>>, %arg11: memref<128x128xbf16, #tpu.memory_space<vmem>>, %arg12: memref<1x128xf32, #tpu.memory_space<vmem>>, %arg13: memref<1x16x128xf32, #tpu.memory_space<vmem>>, %arg14: memref<16x128xbf16, #tpu.memory_space<vmem>>, %arg15: memref<16x128xbf16, #tpu.memory_space<vmem>>, %arg16: memref<16x128xbf16, #tpu.memory_space<vmem>>) attributes {dimension_semantics = [#tpu.dimension_semantics<parallel>, #tpu.dimension_semantics<arbitrary>], iteration_bounds = array<i64: 2, 1>, scalar_prefetch = 0 : i64, scratch_operands = 3 : i64, tpu.core_type = #tpu.core_type<tc>, window_params = [{transform_indices = @transform_0, window_bounds = array<i64: 1, 16, 128>}, {transform_indices = @transform_1, window_bounds = array<i64: 1, 16, 128>}, {transform_indices = @transform_2, window_bounds = array<i64: 1, 16, 128>}, {pipeline_mode = #tpu.pipeline_mode<synchronous>, transform_indices = @transform_3, window_bounds = array<i64: 128, 128>}, {pipeline_mode = #tpu.pipeline_mode<synchronous>, transform_indices = @transform_4, window_bounds = array<i64: 1, 128>}, {pipeline_mode = #tpu.pipeline_mode<synchronous>, transform_indices = @transform_5, window_bounds = array<i64: 128, 128>}, {pipeline_mode = #tpu.pipeline_mode<synchronous>, transform_indices = @transform_6, window_bounds = array<i64: 1, 128>}, {pipeline_mode = #tpu.pipeline_mode<synchronous>, transform_indices = @transform_7, window_bounds = array<i64: 128, 128>}, {pipeline_mode = #tpu.pipeline_mode<synchronous>, transform_indices = @transform_8, window_bounds = array<i64: 1, 128>}, {pipeline_mode = #tpu.pipeline_mode<synchronous>, transform_indices = @transform_9, window_bounds = array<i64: 128, 128>}, {pipeline_mode = #tpu.pipeline_mode<synchronous>, transform_indices = @transform_10, window_bounds = array<i64: 1, 128>}, {transform_indices = @transform_11, window_bounds = array<i64: 1, 16, 128>}]} {
    %c0_i32 = arith.constant 0 : i32
    %0 = arith.cmpi eq, %arg1, %c0_i32 : i32
    %1 = arith.extui %0 : i1 to i32
    %c0_i32_0 = arith.constant 0 : i32
    %2 = arith.cmpi ne, %1, %c0_i32_0 : i32
    scf.if %2 {
      %c0_54 = arith.constant 0 : index
      %c0_55 = arith.constant 0 : index
      %c0_56 = arith.constant 0 : index
      %92 = vector.load %arg3[%c0_54, %c0_55, %c0_56] : memref<1x16x128xbf16, #tpu.memory_space<vmem>>, vector<1x16x128xbf16>
      %93 = vector.shape_cast %92 : vector<1x16x128xbf16> to vector<16x128xbf16>
      %c0_57 = arith.constant 0 : index
      %c0_58 = arith.constant 0 : index
      %c0_59 = arith.constant 0 : index
      %94 = vector.load %arg4[%c0_57, %c0_58, %c0_59] : memref<1x16x128xbf16, #tpu.memory_space<vmem>>, vector<1x16x128xbf16>
      %95 = vector.shape_cast %94 : vector<1x16x128xbf16> to vector<16x128xbf16>
      %c0_60 = arith.constant 0 : index
      %c0_61 = arith.constant 0 : index
      %96 = vector.load %arg7[%c0_60, %c0_61] : memref<128x128xbf16, #tpu.memory_space<vmem>>, vector<128x128xbf16>
      %cst_62 = arith.constant dense<0.000000e+00> : vector<16x128xf32>
      %97 = tpu.matmul %93, %96, %cst_62 {dimension_numbers = #tpu.dot_dimension_numbers<[1], [0], [0], [1], [0, 0, 1, 1], [], []>} : vector<16x128xbf16>, vector<128x128xbf16>, vector<16x128xf32> -> vector<16x128xf32>
      %c0_63 = arith.constant 0 : index
      %c0_64 = arith.constant 0 : index
      %98 = vector.load %arg8[%c0_63, %c0_64] : memref<1x128xf32, #tpu.memory_space<vmem>>, vector<1x128xf32>
      %99 = vector.broadcast %98 : vector<1x128xf32> to vector<16x128xf32>
      %100 = arith.addf %97, %99 : vector<16x128xf32>
      %101 = arith.truncf %100 : vector<16x128xf32> to vector<16x128xbf16>
      %c0_65 = arith.constant 0 : index
      %c0_66 = arith.constant 0 : index
      %102 = vector.load %arg14[%c0_65, %c0_66] : memref<16x128xbf16, #tpu.memory_space<vmem>>, vector<16x128xbf16>
      tpu.vector_store %arg14[%c0_65, %c0_66], %101 {strides = array<i32>} : memref<16x128xbf16, #tpu.memory_space<vmem>>, vector<16x128xbf16>,
      %c0_67 = arith.constant 0 : index
      %c0_68 = arith.constant 0 : index
      %103 = vector.load %arg9[%c0_67, %c0_68] : memref<128x128xbf16, #tpu.memory_space<vmem>>, vector<128x128xbf16>
      %cst_69 = arith.constant dense<0.000000e+00> : vector<16x128xf32>
      %104 = tpu.matmul %95, %103, %cst_69 {dimension_numbers = #tpu.dot_dimension_numbers<[1], [0], [0], [1], [0, 0, 1, 1], [], []>} : vector<16x128xbf16>, vector<128x128xbf16>, vector<16x128xf32> -> vector<16x128xf32>
      %c0_70 = arith.constant 0 : index
      %c0_71 = arith.constant 0 : index
      %105 = vector.load %arg10[%c0_70, %c0_71] : memref<1x128xf32, #tpu.memory_space<vmem>>, vector<1x128xf32>
      %106 = vector.broadcast %105 : vector<1x128xf32> to vector<16x128xf32>
      %107 = arith.addf %104, %106 : vector<16x128xf32>
      %108 = arith.truncf %107 : vector<16x128xf32> to vector<16x128xbf16>
      %c0_72 = arith.constant 0 : index
      %c0_73 = arith.constant 0 : index
      %109 = vector.load %arg15[%c0_72, %c0_73] : memref<16x128xbf16, #tpu.memory_space<vmem>>, vector<16x128xbf16>
      tpu.vector_store %arg15[%c0_72, %c0_73], %108 {strides = array<i32>} : memref<16x128xbf16, #tpu.memory_space<vmem>>, vector<16x128xbf16>,
    } else {
    }
    %c0 = arith.constant 0 : index
    %c0_1 = arith.constant 0 : index
    %c0_2 = arith.constant 0 : index
    %3 = vector.load %arg2[%c0, %c0_1, %c0_2] : memref<1x16x128xbf16, #tpu.memory_space<vmem>>, vector<1x16x128xbf16>
    %4 = vector.shape_cast %3 : vector<1x16x128xbf16> to vector<16x128xbf16>
    %c0_3 = arith.constant 0 : index
    %c0_4 = arith.constant 0 : index
    %5 = vector.load %arg5[%c0_3, %c0_4] : memref<128x128xbf16, #tpu.memory_space<vmem>>, vector<128x128xbf16>
    %cst = arith.constant dense<0.000000e+00> : vector<16x128xf32>
    %6 = tpu.matmul %4, %5, %cst {dimension_numbers = #tpu.dot_dimension_numbers<[1], [0], [0], [1], [0, 0, 1, 1], [], []>} : vector<16x128xbf16>, vector<128x128xbf16>, vector<16x128xf32> -> vector<16x128xf32>
    %c0_5 = arith.constant 0 : index
    %c0_6 = arith.constant 0 : index
    %7 = vector.load %arg6[%c0_5, %c0_6] : memref<1x128xf32, #tpu.memory_space<vmem>>, vector<1x128xf32>
    %8 = vector.broadcast %7 : vector<1x128xf32> to vector<16x128xf32>
    %9 = arith.addf %6, %8 : vector<16x128xf32>
    %10 = arith.truncf %9 : vector<16x128xf32> to vector<16x128xbf16>
    %11 = vector.extract_strided_slice %10 {offsets = [0, 0], sizes = [16, 32], strides = [1, 1]} : vector<16x128xbf16> to vector<16x32xbf16>
    %c0_7 = arith.constant 0 : index
    %c0_8 = arith.constant 0 : index
    %12 = vector.load %arg14[%c0_7, %c0_8] : memref<16x128xbf16, #tpu.memory_space<vmem>>, vector<16x32xbf16>
    %c0_9 = arith.constant 0 : index
    %c0_10 = arith.constant 0 : index
    %13 = vector.load %arg15[%c0_9, %c0_10] : memref<16x128xbf16, #tpu.memory_space<vmem>>, vector<16x32xbf16>
    %cst_11 = arith.constant dense<0.000000e+00> : vector<16x16xf32>
    %14 = tpu.matmul %11, %12, %cst_11 {dimension_numbers = #tpu.dot_dimension_numbers<[1], [1], [0], [0], [0, 0, 1, 0], [], []>} : vector<16x32xbf16>, vector<16x32xbf16>, vector<16x16xf32> -> vector<16x16xf32>
    %cst_12 = arith.constant dense<0xFF800000> : vector<16xf32>
    %15 = vector.multi_reduction <maximumf>, %14, %cst_12 [1] : vector<16x16xf32> to vector<16xf32>
    %16 = vector.shape_cast %15 : vector<16xf32> to vector<16x1xf32>
    %17 = vector.broadcast %16 : vector<16x1xf32> to vector<16x16xf32>
    %18 = arith.subf %14, %17 : vector<16x16xf32>
    %19 = math.exp %18 : vector<16x16xf32>
    %cst_13 = arith.constant dense<0.000000e+00> : vector<16xf32>
    %20 = vector.multi_reduction <add>, %19, %cst_13 [1] : vector<16x16xf32> to vector<16xf32>
    %21 = vector.shape_cast %20 : vector<16xf32> to vector<16x1xf32>
    %22 = arith.truncf %19 : vector<16x16xf32> to vector<16x16xbf16>
    %cst_14 = arith.constant dense<0.000000e+00> : vector<16x32xf32>
    %23 = tpu.matmul %22, %13, %cst_14 {dimension_numbers = #tpu.dot_dimension_numbers<[1], [0], [0], [1], [0, 0, 1, 1], [], []>} : vector<16x16xbf16>, vector<16x32xbf16>, vector<16x32xf32> -> vector<16x32xf32>
    %24 = tpu.reciprocal %21 {approx = true} : vector<16x1xf32> -> vector<16x1xf32>
    %25 = vector.broadcast %24 : vector<16x1xf32> to vector<16x32xf32>
    %26 = arith.mulf %23, %25 : vector<16x32xf32>
    %27 = arith.truncf %26 : vector<16x32xf32> to vector<16x32xbf16>
    %c0_15 = arith.constant 0 : index
    %c0_16 = arith.constant 0 : index
    %28 = vector.load %arg16[%c0_15, %c0_16] : memref<16x128xbf16, #tpu.memory_space<vmem>>, vector<16x32xbf16>
    tpu.vector_store %arg16[%c0_15, %c0_16], %27 {strides = array<i32>} : memref<16x128xbf16, #tpu.memory_space<vmem>>, vector<16x32xbf16>,
    %29 = vector.extract_strided_slice %10 {offsets = [0, 32], sizes = [16, 32], strides = [1, 1]} : vector<16x128xbf16> to vector<16x32xbf16>
    %c0_17 = arith.constant 0 : index
    %c32 = arith.constant 32 : index
    %30 = vector.load %arg14[%c0_17, %c32] : memref<16x128xbf16, #tpu.memory_space<vmem>>, vector<16x32xbf16>
    %c0_18 = arith.constant 0 : index
    %c32_19 = arith.constant 32 : index
    %31 = vector.load %arg15[%c0_18, %c32_19] : memref<16x128xbf16, #tpu.memory_space<vmem>>, vector<16x32xbf16>
    %cst_20 = arith.constant dense<0.000000e+00> : vector<16x16xf32>
    %32 = tpu.matmul %29, %30, %cst_20 {dimension_numbers = #tpu.dot_dimension_numbers<[1], [1], [0], [0], [0, 0, 1, 0], [], []>} : vector<16x32xbf16>, vector<16x32xbf16>, vector<16x16xf32> -> vector<16x16xf32>
    %cst_21 = arith.constant dense<0xFF800000> : vector<16xf32>
    %33 = vector.multi_reduction <maximumf>, %32, %cst_21 [1] : vector<16x16xf32> to vector<16xf32>
    %34 = vector.shape_cast %33 : vector<16xf32> to vector<16x1xf32>
    %35 = vector.broadcast %34 : vector<16x1xf32> to vector<16x16xf32>
    %36 = arith.subf %32, %35 : vector<16x16xf32>
    %37 = math.exp %36 : vector<16x16xf32>
    %cst_22 = arith.constant dense<0.000000e+00> : vector<16xf32>
    %38 = vector.multi_reduction <add>, %37, %cst_22 [1] : vector<16x16xf32> to vector<16xf32>
    %39 = vector.shape_cast %38 : vector<16xf32> to vector<16x1xf32>
    %40 = arith.truncf %37 : vector<16x16xf32> to vector<16x16xbf16>
    %cst_23 = arith.constant dense<0.000000e+00> : vector<16x32xf32>
    %41 = tpu.matmul %40, %31, %cst_23 {dimension_numbers = #tpu.dot_dimension_numbers<[1], [0], [0], [1], [0, 0, 1, 1], [], []>} : vector<16x16xbf16>, vector<16x32xbf16>, vector<16x32xf32> -> vector<16x32xf32>
    %42 = tpu.reciprocal %39 {approx = true} : vector<16x1xf32> -> vector<16x1xf32>
    %43 = vector.broadcast %42 : vector<16x1xf32> to vector<16x32xf32>
    %44 = arith.mulf %41, %43 : vector<16x32xf32>
    %45 = arith.truncf %44 : vector<16x32xf32> to vector<16x32xbf16>
    %c0_24 = arith.constant 0 : index
    %c32_25 = arith.constant 32 : index
    %46 = vector.load %arg16[%c0_24, %c32_25] : memref<16x128xbf16, #tpu.memory_space<vmem>>, vector<16x32xbf16>
    tpu.vector_store %arg16[%c0_24, %c32_25], %45 {strides = array<i32>} : memref<16x128xbf16, #tpu.memory_space<vmem>>, vector<16x32xbf16>,
    %47 = vector.extract_strided_slice %10 {offsets = [0, 64], sizes = [16, 32], strides = [1, 1]} : vector<16x128xbf16> to vector<16x32xbf16>
    %c0_26 = arith.constant 0 : index
    %c64 = arith.constant 64 : index
    %48 = vector.load %arg14[%c0_26, %c64] : memref<16x128xbf16, #tpu.memory_space<vmem>>, vector<16x32xbf16>
    %c0_27 = arith.constant 0 : index
    %c64_28 = arith.constant 64 : index
    %49 = vector.load %arg15[%c0_27, %c64_28] : memref<16x128xbf16, #tpu.memory_space<vmem>>, vector<16x32xbf16>
    %cst_29 = arith.constant dense<0.000000e+00> : vector<16x16xf32>
    %50 = tpu.matmul %47, %48, %cst_29 {dimension_numbers = #tpu.dot_dimension_numbers<[1], [1], [0], [0], [0, 0, 1, 0], [], []>} : vector<16x32xbf16>, vector<16x32xbf16>, vector<16x16xf32> -> vector<16x16xf32>
    %cst_30 = arith.constant dense<0xFF800000> : vector<16xf32>
    %51 = vector.multi_reduction <maximumf>, %50, %cst_30 [1] : vector<16x16xf32> to vector<16xf32>
    %52 = vector.shape_cast %51 : vector<16xf32> to vector<16x1xf32>
    %53 = vector.broadcast %52 : vector<16x1xf32> to vector<16x16xf32>
    %54 = arith.subf %50, %53 : vector<16x16xf32>
    %55 = math.exp %54 : vector<16x16xf32>
    %cst_31 = arith.constant dense<0.000000e+00> : vector<16xf32>
    %56 = vector.multi_reduction <add>, %55, %cst_31 [1] : vector<16x16xf32> to vector<16xf32>
    %57 = vector.shape_cast %56 : vector<16xf32> to vector<16x1xf32>
    %58 = arith.truncf %55 : vector<16x16xf32> to vector<16x16xbf16>
    %cst_32 = arith.constant dense<0.000000e+00> : vector<16x32xf32>
    %59 = tpu.matmul %58, %49, %cst_32 {dimension_numbers = #tpu.dot_dimension_numbers<[1], [0], [0], [1], [0, 0, 1, 1], [], []>} : vector<16x16xbf16>, vector<16x32xbf16>, vector<16x32xf32> -> vector<16x32xf32>
    %60 = tpu.reciprocal %57 {approx = true} : vector<16x1xf32> -> vector<16x1xf32>
    %61 = vector.broadcast %60 : vector<16x1xf32> to vector<16x32xf32>
    %62 = arith.mulf %59, %61 : vector<16x32xf32>
    %63 = arith.truncf %62 : vector<16x32xf32> to vector<16x32xbf16>
    %c0_33 = arith.constant 0 : index
    %c64_34 = arith.constant 64 : index
    %64 = vector.load %arg16[%c0_33, %c64_34] : memref<16x128xbf16, #tpu.memory_space<vmem>>, vector<16x32xbf16>
    tpu.vector_store %arg16[%c0_33, %c64_34], %63 {strides = array<i32>} : memref<16x128xbf16, #tpu.memory_space<vmem>>, vector<16x32xbf16>,
    %65 = vector.extract_strided_slice %10 {offsets = [0, 96], sizes = [16, 32], strides = [1, 1]} : vector<16x128xbf16> to vector<16x32xbf16>
    %c0_35 = arith.constant 0 : index
    %c96 = arith.constant 96 : index
    %66 = vector.load %arg14[%c0_35, %c96] : memref<16x128xbf16, #tpu.memory_space<vmem>>, vector<16x32xbf16>
    %c0_36 = arith.constant 0 : index
    %c96_37 = arith.constant 96 : index
    %67 = vector.load %arg15[%c0_36, %c96_37] : memref<16x128xbf16, #tpu.memory_space<vmem>>, vector<16x32xbf16>
    %cst_38 = arith.constant dense<0.000000e+00> : vector<16x16xf32>
    %68 = tpu.matmul %65, %66, %cst_38 {dimension_numbers = #tpu.dot_dimension_numbers<[1], [1], [0], [0], [0, 0, 1, 0], [], []>} : vector<16x32xbf16>, vector<16x32xbf16>, vector<16x16xf32> -> vector<16x16xf32>
    %cst_39 = arith.constant dense<0xFF800000> : vector<16xf32>
    %69 = vector.multi_reduction <maximumf>, %68, %cst_39 [1] : vector<16x16xf32> to vector<16xf32>
    %70 = vector.shape_cast %69 : vector<16xf32> to vector<16x1xf32>
    %71 = vector.broadcast %70 : vector<16x1xf32> to vector<16x16xf32>
    %72 = arith.subf %68, %71 : vector<16x16xf32>
    %73 = math.exp %72 : vector<16x16xf32>
    %cst_40 = arith.constant dense<0.000000e+00> : vector<16xf32>
    %74 = vector.multi_reduction <add>, %73, %cst_40 [1] : vector<16x16xf32> to vector<16xf32>
    %75 = vector.shape_cast %74 : vector<16xf32> to vector<16x1xf32>
    %76 = arith.truncf %73 : vector<16x16xf32> to vector<16x16xbf16>
    %cst_41 = arith.constant dense<0.000000e+00> : vector<16x32xf32>
    %77 = tpu.matmul %76, %67, %cst_41 {dimension_numbers = #tpu.dot_dimension_numbers<[1], [0], [0], [1], [0, 0, 1, 1], [], []>} : vector<16x16xbf16>, vector<16x32xbf16>, vector<16x32xf32> -> vector<16x32xf32>
    %78 = tpu.reciprocal %75 {approx = true} : vector<16x1xf32> -> vector<16x1xf32>
    %79 = vector.broadcast %78 : vector<16x1xf32> to vector<16x32xf32>
    %80 = arith.mulf %77, %79 : vector<16x32xf32>
    %81 = arith.truncf %80 : vector<16x32xf32> to vector<16x32xbf16>
    %c0_42 = arith.constant 0 : index
    %c96_43 = arith.constant 96 : index
    %82 = vector.load %arg16[%c0_42, %c96_43] : memref<16x128xbf16, #tpu.memory_space<vmem>>, vector<16x32xbf16>
    tpu.vector_store %arg16[%c0_42, %c96_43], %81 {strides = array<i32>} : memref<16x128xbf16, #tpu.memory_space<vmem>>, vector<16x32xbf16>,
    %c0_44 = arith.constant 0 : index
    %c0_45 = arith.constant 0 : index
    %83 = vector.load %arg16[%c0_44, %c0_45] : memref<16x128xbf16, #tpu.memory_space<vmem>>, vector<16x128xbf16>
    %c0_46 = arith.constant 0 : index
    %c0_47 = arith.constant 0 : index
    %84 = vector.load %arg11[%c0_46, %c0_47] : memref<128x128xbf16, #tpu.memory_space<vmem>>, vector<128x128xbf16>
    %cst_48 = arith.constant dense<0.000000e+00> : vector<16x128xf32>
    %85 = tpu.matmul %83, %84, %cst_48 {dimension_numbers = #tpu.dot_dimension_numbers<[1], [0], [0], [1], [0, 0, 1, 1], [], []>} : vector<16x128xbf16>, vector<128x128xbf16>, vector<16x128xf32> -> vector<16x128xf32>
    %c0_49 = arith.constant 0 : index
    %c0_50 = arith.constant 0 : index
    %86 = vector.load %arg12[%c0_49, %c0_50] : memref<1x128xf32, #tpu.memory_space<vmem>>, vector<1x128xf32>
    %87 = vector.broadcast %86 : vector<1x128xf32> to vector<16x128xf32>
    %88 = arith.addf %85, %87 : vector<16x128xf32>
    %c0_51 = arith.constant 0 : index
    %c0_52 = arith.constant 0 : index
    %c0_53 = arith.constant 0 : index
    %89 = vector.load %arg13[%c0_51, %c0_52, %c0_53] : memref<1x16x128xf32, #tpu.memory_space<vmem>>, vector<1x16x128xf32>
    %90 = vector.shape_cast %89 : vector<1x16x128xf32> to vector<16x128xf32>
    %91 = vector.shape_cast %88 : vector<16x128xf32> to vector<1x16x128xf32>
    tpu.vector_store %arg13[%c0_51, %c0_52, %c0_53], %91 {strides = array<i32>} : memref<1x16x128xf32, #tpu.memory_space<vmem>>, vector<1x16x128xf32>,
    return
  }
  func.func @transform_0(%arg0: i32, %arg1: i32) -> (i32, i32, i32) {
    %c0_i32 = arith.constant 0 : i32
    %c0_i32_0 = arith.constant 0 : i32
    return %arg0, %arg1, %c0_i32 : i32, i32, i32
  }
  func.func @transform_1(%arg0: i32, %arg1: i32) -> (i32, i32, i32) {
    %c0_i32 = arith.constant 0 : i32
    %c0_i32_0 = arith.constant 0 : i32
    %c0_i32_1 = arith.constant 0 : i32
    return %arg0, %c0_i32, %c0_i32_0 : i32, i32, i32
  }
  func.func @transform_2(%arg0: i32, %arg1: i32) -> (i32, i32, i32) {
    %c0_i32 = arith.constant 0 : i32
    %c0_i32_0 = arith.constant 0 : i32
    %c0_i32_1 = arith.constant 0 : i32
    return %arg0, %c0_i32, %c0_i32_0 : i32, i32, i32
  }
  func.func @transform_3(%arg0: i32, %arg1: i32) -> (i32, i32) {
    %c0_i32 = arith.constant 0 : i32
    %c0_i32_0 = arith.constant 0 : i32
    %c0_i32_1 = arith.constant 0 : i32
    return %c0_i32, %c0_i32_0 : i32, i32
  }
  func.func @transform_4(%arg0: i32, %arg1: i32) -> (i32, i32) {
    %c0_i32 = arith.constant 0 : i32
    %c0_i32_0 = arith.constant 0 : i32
    %c0_i32_1 = arith.constant 0 : i32
    return %c0_i32, %c0_i32_0 : i32, i32
  }
  func.func @transform_5(%arg0: i32, %arg1: i32) -> (i32, i32) {
    %c0_i32 = arith.constant 0 : i32
    %c0_i32_0 = arith.constant 0 : i32
    %c0_i32_1 = arith.constant 0 : i32
    return %c0_i32, %c0_i32_0 : i32, i32
  }
  func.func @transform_6(%arg0: i32, %arg1: i32) -> (i32, i32) {
    %c0_i32 = arith.constant 0 : i32
    %c0_i32_0 = arith.constant 0 : i32
    %c0_i32_1 = arith.constant 0 : i32
    return %c0_i32, %c0_i32_0 : i32, i32
  }
  func.func @transform_7(%arg0: i32, %arg1: i32) -> (i32, i32) {
    %c0_i32 = arith.constant 0 : i32
    %c0_i32_0 = arith.constant 0 : i32
    %c0_i32_1 = arith.constant 0 : i32
    return %c0_i32, %c0_i32_0 : i32, i32
  }
  func.func @transform_8(%arg0: i32, %arg1: i32) -> (i32, i32) {
    %c0_i32 = arith.constant 0 : i32
    %c0_i32_0 = arith.constant 0 : i32
    %c0_i32_1 = arith.constant 0 : i32
    return %c0_i32, %c0_i32_0 : i32, i32
  }
  func.func @transform_9(%arg0: i32, %arg1: i32) -> (i32, i32) {
    %c0_i32 = arith.constant 0 : i32
    %c0_i32_0 = arith.constant 0 : i32
    %c0_i32_1 = arith.constant 0 : i32
    return %c0_i32, %c0_i32_0 : i32, i32
  }
  func.func @transform_10(%arg0: i32, %arg1: i32) -> (i32, i32) {
    %c0_i32 = arith.constant 0 : i32
    %c0_i32_0 = arith.constant 0 : i32
    %c0_i32_1 = arith.constant 0 : i32
    return %c0_i32, %c0_i32_0 : i32, i32
  }
  func.func @transform_11(%arg0: i32, %arg1: i32) -> (i32, i32, i32) {
    %c0_i32 = arith.constant 0 : i32
    %c0_i32_0 = arith.constant 0 : i32
    return %arg0, %arg1, %c0_i32 : i32, i32, i32
  }
}

</mosaic_0001>

<bundles_post_ra>
// kernel: tpu_custom_call.1
= control target key start
LH: loop header
LB: loop body
LE: loop exit
PB: predicated region body
PF: predicated region fallthrough
CT: control target
= control target key end

     0   :  { %s3135_s0 = inlined_call_operand.hbm [shape: bf16[2,16,128], index: 0, kind: input, shape index: {}]   ;;  %s3136_s1 = inlined_call_operand.hbm [shape: bf16[2,16,128], index: 1, kind: input, shape index: {}]   ;;  %s3137_s2 = inlined_call_operand.hbm [shape: bf16[2,16,128], index: 2, kind: input, shape index: {}]   ;;  %s3138_s3 = inlined_call_operand.hbm [shape: bf16[128,128], index: 3, kind: input, shape index: {}]   ;;  %s3139_s4 = inlined_call_operand.vmem [shape: f32[1,128], index: 4, kind: input, shape index: {}]   ;;  %s3140_s5 = inlined_call_operand.hbm [shape: bf16[128,128], index: 5, kind: input, shape index: {}]   ;;  %s3141_s6 = inlined_call_operand.vmem [shape: f32[1,128], index: 6, kind: input, shape index: {}]   ;;  %s3142_s7 = inlined_call_operand.hbm [shape: bf16[128,128], index: 7, kind: input, shape index: {}]   ;;  %s3143_s8 = inlined_call_operand.vmem [shape: f32[1,128], index: 8, kind: input, shape index: {}]   ;;  %s3144_s9 = inlined_call_operand.hbm [shape: bf16[128,128], index: 9, kind: input, shape index: {}]   ;;  %s3145_s10 = inlined_call_operand.vmem [shape: f32[1,128], index: 10, kind: input, shape index: {}]   ;;  %s3146_s11 = inlined_call_operand.hbm [shape: f32[2,16,128], index: 11, kind: output, shape index: {}]  }
   0x1   :  { %3173 = sst [smem:[#allocation31_spill]] %s3136_s1 }
   0x2   :  { %3174 = sst [smem:[#allocation32_spill]] %s3138_s3 }
   0x3   :  { %3175 = sst [smem:[#allocation33_spill]] %s3139_s4 }
   0x4   :  { %3176 = sst [smem:[#allocation34_spill]] %s3141_s6 }
   0x5   :  { %3177 = sst [smem:[#allocation35_spill]] %s3142_s7 }
   0x6   :  { %3178 = sst [smem:[#allocation36_spill]] %s3143_s8 }
   0x7   :  { %3179 = sst [smem:[#allocation37_spill]] %s3145_s10 }
   0x8   :  { %3180 = sst [smem:[#allocation38_spill]] %s3146_s11 }
   0x9   :  { %16 = vsyncpa [#allocation6], 0 }
   0xa   :  { %18 = vsyncpa [#allocation6 + $0x1], 0 }
   0xb   :  { %19 = vsyncpa [#allocation9], 0 }
   0xc   :  { %21 = vsyncpa [#allocation9 + $0x1], 0 }
   0xd   :  { %22 = vsyncpa [#allocation12], 0 }
   0xe   :  { %23 = vsyncpa [#allocation15], 0 }
   0xf   :  { %24 = vsyncpa [#allocation7], 0 }
  0x10   :  { %26 = vsyncpa [#allocation7 + $0x1], 0  ;;  %s2572_s17 = smov 0   ;;  %s2574_s18 = smov 0  }
  0x11   :  { %s2576_s19 = smov 0   ;;  %s2578_s20 = smov 0  }
  0x12   :  { %s2580_s21 = smov 0   ;;  %s2582_s22 = smov 0  }
  0x13 LB: > { %3181 = sst [smem:[#allocation23_spill]] %s2473_s17  ;;  %s2603_s23 = sadd.s32 4294967295, %s2493_s22   ;;  %s2493_s22 = sphi %s2582_s22, %s32_s22   ;;  %s2489_s21 = sphi %s2580_s21, %s3229_s21   ;;  %s2485_s20 = sphi %s2578_s20, %s3228_s20   ;;  %s2481_s19 = sphi %s2576_s19, %s3232_s19   ;;  %s2477_s18 = sphi %s2574_s18, %s3231_s18   ;;  %s2473_s17 = sphi %s2572_s17, %s3230_s17  }
  0x14   : > { %3182 = sst [smem:[#allocation24_spill]] %s2485_s20  ;;  %s1747_s24 = sadd.s32 4294967294, %s2493_s22  }
  0x15   : > { %3183 = sst [smem:[#allocation25_spill]] %s2489_s21  ;;  %p66_p0 = scmp.ne.s32.totalorder %s2477_s18, %s2473_s17 }
  0x16   : > { %3184 = sst [smem:[#allocation26_spill]] %s2493_s22  ;;  %p3149_p1 = scmp.eq.s32.totalorder %s2603_s23, 0 }
  0x17   : > { %p318_p3 = scmp.eq.s32.totalorder %s1747_s24, 1  ;;  %p1748_p5 = scmp.ge.s32.totalorder %s2493_s22, 1 }
  0x18   : > { %p2612_p4 = por %p3149_p1, %p66_p0  ;;  %p325_p7 = scmp.lt.s32.totalorder %s2493_s22, 3 }
  0x19   : > { %p2617_p6 = por %p318_p3, %p66_p0  ;;  %s2495_s28 = smov [#allocation11]  }
  0x1a   : > { %s3185_s25 = scalar_select %p2612_p4, 1, 0 }
  0x1b   : > { %s3186_s26 = scalar_select %p2617_p6, 1, 0 }
  0x1c   : > { %p2622_p8 = pnand %p1748_p5, %p325_p7  ;;  %s337_s29 = sshll.u32 %s2495_s28, 4  ;;  %s2626_s29 = int_to_ptr.vmem [resolvable:$true] %s337_s29 }
  0x1d   : > { %3187 = sst [smem:[#allocation27_spill]] %s3186_s26  ;;  %s2496_s12 = smov [#allocation14]  }
  0x1e   : > { %s3188_s27 = scalar_select %p2622_p8, 1, 0 }
  0x1f   : > { %p2032_p9 = pneg %p2622_p8  ;;  %s369_s13 = sshll.u32 %s2496_s12, 4  ;;  %s2637_s13 = int_to_ptr.vmem [resolvable:$true] %s369_s13 }
  0x20   : > { %s3190_s3 = sld [smem:[#allocation32_spill]] }
  0x21   : > { %p2633_p11 = pnand %p2032_p9, %p3149_p1 }
  0x23   : > { %s3189_s30 = scalar_select %p2633_p11, 1, 0 }
  0x24   : > { %p2647_p13 = pneg %p2633_p11 }
  0x26   : > { %s2197_s16 = scalar_lea.hbm %s3190_s3, 1024 }
  0x27   : > { %p2198_p12 = scmp.ne.s32.totalorder %s3190_s3, %s2197_s16  ;;  %p2204_p5 = scmp.lt.u32.totalorder %s2197_s16, %s3190_s3 }
  0x28   : > { %s3191_s26 = scalar_select %p2647_p13, 1, 0 }
  0x29   : > { %p2200_p0 = pnand %p2647_p13, %p2198_p12 }
  0x2b   : > { %p2201_p3 = pneg %p2200_p0 }
  0x2d   : > { %p2206_p7 = pnand %p2204_p5, %p2201_p3 }
  0x2f   : > { %2209 = shalt.err (!%p2206_p7)
}
  0x30   : > { %s2210_s14 = scalar_lea.vmem %s2626_s29, 1024  ;;  %p2218_p2 = scmp.lt.s32.totalorder %s2626_s29, %s2626_s29 }
  0x31   : > { %p2211_p9 = scmp.ne.s32.totalorder %s2626_s29, %s2210_s14  ;;  %p2219_p6 = scmp.lt.s32.totalorder %s2210_s14, %s2210_s14 }
  0x33   : > { %p2213_p10 = pnand %p2211_p9, %p2647_p13  ;;  %p2220_p12 = por %p2219_p6, %p2218_p2 }
  0x35   : > { %p2214_p1 = pneg %p2213_p10 }
  0x37   : > { %p2221_p0 = pnand %p2220_p12, %p2214_p1 }
  0x39   : > { %2224 = shalt.err (!%p2221_p0)
}
  0x3a   : > { %s3151_s15 = smov 64   ;;  %s3153_s17 = smov 4  }
  0x3b   : > { %2035 = dma.hbm_to_vmem [thread:$0]  (!%p2633_p11), %s3190_s3, 1024, %s2626_s29, [#allocation12], %s3151_s15, %s3151_s15, %s3153_s17  }
  0x3c   : > { %s3192_s7 = sld [smem:[#allocation35_spill]] }
  0x42   : > { %s2225_s14 = scalar_lea.hbm %s3192_s7, 1024 }
  0x43   : > { %p2226_p1 = scmp.ne.s32.totalorder %s3192_s7, %s2225_s14  ;;  %p2232_p10 = scmp.lt.u32.totalorder %s2225_s14, %s3192_s7 }
  0x45   : > { %p2228_p2 = pnand %p2226_p1, %p2647_p13 }
  0x47   : > { %p2229_p6 = pneg %p2228_p2 }
  0x49   : > { %p2234_p3 = pnand %p2232_p10, %p2229_p6 }
  0x4b   : > { %2237 = shalt.err (!%p2234_p3)
}
  0x4c   : > { %s2238_s29 = scalar_lea.vmem %s2637_s13, 1024  ;;  %p2246_p12 = scmp.lt.s32.totalorder %s2637_s13, %s2637_s13 }
  0x4d   : > { %p2239_p5 = scmp.ne.s32.totalorder %s2637_s13, %s2238_s29  ;;  %p2247_p0 = scmp.lt.s32.totalorder %s2238_s29, %s2238_s29 }
  0x4f   : > { %p2241_p7 = pnand %p2239_p5, %p2647_p13  ;;  %p2248_p1 = por %p2247_p0, %p2246_p12 }
  0x51   : > { %p2242_p9 = pneg %p2241_p7 }
  0x53   : > { %p2249_p2 = pnand %p2248_p1, %p2242_p9 }
  0x55   : > { %2252 = shalt.err (!%p2249_p2)
}
  0x56   : > { %2041 = dma.hbm_to_vmem [thread:$0]  (!%p2633_p11), %s3192_s7, 1024, %s2637_s13, [#allocation15], %s3151_s15, %s3151_s15, %s3153_s17  }
  0x57   : > { %s44_s11 = sadd.s32 1, %s2489_s21  ;;  %s53_s20 = sadd.s32 1, %s2481_s19 }
  0x58   : > { %p46_p6 = scmp.ge.s32.totalorder %s44_s11, 2  ;;  %p60_p10 = scmp.ne.s32.totalorder %s2481_s19, %s2477_s18 }
  0x59   : > { %p61_p3 = scmp.eq.s32.totalorder %s2493_s22, 0  ;;  %p2063_p5 = scmp.lt.s32.totalorder %s2493_s22, 2 }
  0x5a   : > { %s3234_s11 = smov (%p46_p6, %s44_s11), 0  ;;  %p3194_p9 = scmp.eq.s32.totalorder %s2603_s23, 1 }
  0x5b   : > { %3193 = sst [smem:[#allocation28_spill]] %s3234_s11  ;;  %p62_p7 = por %p61_p3, %p60_p10 }
  0x5c   : > { %p2707_p12 = por %p3194_p9, %p60_p10  ;;  %s48_s24 = ssub.s32 %s2489_s21, %s3234_s11 }
  0x5d   : > { %s3155_s28 = sand.u32 1, %s2481_s19   ;;  %p51_p0 = scmp.eq.s32.totalorder %s48_s24, 0 }
  0x5e   : > { %s3195_s16 = scalar_select %p2707_p12, 1, 0 }
  0x5f   : > { %s2716_s13 = sshll.u32 %s3155_s28, 3  ;;  %s2719_s12 = sshll.u32 %s2489_s21, 7 }
  0x60   : > { %3196 = sst [smem:[#allocation29_spill]] %s3195_s16  ;;  %p2721_p1 = pnand %p2063_p5, %p62_p7 }
  0x61   : > { %s2726_s29 = scalar_select %p51_p0, %s2481_s19, %s53_s20  }
  0x62   : > { %s3197_s14 = scalar_select %p2721_p1, 1, 0 }
  0x63   : > { %3198 = sst [smem:[#allocation30_spill]] %s2726_s29  ;;  %s425_s8 = sand.u32 1, %s2493_s22  }
  0x64   : > { %s3199_s1 = sld [smem:[#allocation31_spill]]  ;;  %s429_s24 = scalar_lea.vmem [#allocation8], %s2716_s13 }
  0x65   : > { %s436_s28 = sshll.u32 %s429_s24, 4  ;;  %s2738_s3 = scalar_lea.sflag [#allocation9], %s425_s8  ;;  %s2736_s28 = int_to_ptr.vmem [resolvable:$true] %s436_s28 }
  0x66   : > { %p2744_p6 = pneg %p2721_p1 }
  0x68   : > { %s3200_s20 = scalar_select %p2744_p6, 1, 0 }
  0x6a   : > { %s2733_s17 = scalar_lea.hbm %s3199_s1, %s2719_s12  ;;  %s2258_s11 = scalar_lea.hbm %s3199_s1, 256 }
  0x6b   : > { %s2253_s7 = scalar_lea.hbm %s2733_s17, 128  ;;  %p2259_p5 = scmp.lt.u32.totalorder %s2733_s17, %s3199_s1 }
  0x6c   : > { %p2254_p2 = scmp.ne.s32.totalorder %s2733_s17, %s2253_s7  ;;  %p2260_p7 = scmp.lt.u32.totalorder %s2258_s11, %s2253_s7 }
  0x6d   : > { %p2262_p0 = scmp.lt.u32.totalorder %s2253_s7, %s2733_s17 }
  0x6e   : > { %p2256_p10 = pnand %p2744_p6, %p2254_p2  ;;  %p2261_p9 = por %p2260_p7, %p2259_p5 }
  0x70   : > { %p2257_p3 = pneg %p2256_p10  ;;  %p2263_p12 = por %p2262_p0, %p2261_p9 }
  0x72   : > { %p2264_p4 = pnand %p2263_p12, %p2257_p3 }
  0x74   : > { %2267 = shalt.err (!%p2264_p4)
}
  0x75   : > { %s2268_s8 = scalar_lea.vmem %s2736_s28, 128  ;;  %s2499_s15 = smov [#allocation8]  }
  0x76   : > { %p2269_p2 = scmp.ne.s32.totalorder %s2736_s28, %s2268_s8  ;;  %s2273_s10 = sshll.u32 %s2499_s15, 4  ;;  %s2274_s10 = int_to_ptr.vmem [resolvable:$false] %s2273_s10 }
  0x77   : > { %s2275_s21 = scalar_lea.vmem %s2274_s10, 256  ;;  %p2276_p11 = scmp.lt.s32.totalorder %s2736_s28, %s2274_s10 }
  0x78   : > { %p2271_p10 = pnand %p2269_p2, %p2744_p6  ;;  %p2277_p13 = scmp.lt.s32.totalorder %s2275_s21, %s2268_s8 }
  0x7a   : > { %p2272_p8 = pneg %p2271_p10  ;;  %p2278_p5 = por %p2277_p13, %p2276_p11 }
  0x7c   : > { %p2279_p7 = pnand %p2278_p5, %p2272_p8 }
  0x7e   : > { %2282 = shalt.err (!%p2279_p7)
}
  0x7f   : > { %s3201_s7 = smov 4   ;;  %s3202_s11 = smov 64  }
  0x80   : > { %2051 = dma.hbm_to_vmem [thread:$0]  (!%p2721_p1), %s2733_s17, 128, %s2736_s28, %s2738_s3, %s3202_s11, %s3202_s11, %s3201_s7  }
  0x81   : > { %s2500_s24 = smov [#allocation13]   ;;  %s2501_s15 = smov [#allocation16]  }
  0x82   : > { %s353_s1 = sshll.u32 %s2500_s24, 4  ;;  %s385_s29 = sshll.u32 %s2501_s15, 4  ;;  %s354_s1 = int_to_ptr.vmem [resolvable:$true] %s353_s1  ;;  %s386_s29 = int_to_ptr.vmem [resolvable:$true] %s385_s29 }
  0x83   : > { %s2283_s21 = scalar_lea.hbm %s3140_s5, 1024  ;;  %p3203_p8 = scmp.ne.s32.totalorder %s3191_s26, 0 }
  0x84   : > { %p2284_p4 = scmp.ne.s32.totalorder %s3140_s5, %s2283_s21  ;;  %p2290_p12 = scmp.lt.u32.totalorder %s2283_s21, %s3140_s5 }
  0x86   : > { %p2286_p11 = pnand %p2284_p4, %p3203_p8 }
  0x88   : > { %p2287_p13 = pneg %p2286_p11 }
  0x8a   : > { %p2292_p3 = pnand %p2290_p12, %p2287_p13 }
  0x8c   : > { %2295 = shalt.err (!%p2292_p3)
}
  0x8d   : > { %s2296_s17 = scalar_lea.vmem %s354_s1, 1024  ;;  %p2304_p10 = scmp.lt.s32.totalorder %s354_s1, %s354_s1 }
  0x8e   : > { %p2297_p9 = scmp.ne.s32.totalorder %s354_s1, %s2296_s17  ;;  %p2305_p5 = scmp.lt.s32.totalorder %s2296_s17, %s2296_s17 }
  0x90   : > { %p2299_p0 = pnand %p2297_p9, %p3203_p8  ;;  %p2306_p7 = por %p2305_p5, %p2304_p10 }
  0x92   : > { %p2300_p2 = pneg %p2299_p0 }
  0x94   : > { %p2307_p1 = pnand %p2306_p7, %p2300_p2 }
  0x96   : > { %2310 = shalt.err (!%p2307_p1)
}
  0x97   : > { %p3204_p4 = scmp.ne.s32.totalorder %s3189_s30, 0  ;;  %s2311_s28 = scalar_lea.hbm %s3144_s9, 1024 }
  0x98   : > { %p2312_p11 = scmp.ne.s32.totalorder %s3144_s9, %s2311_s28  ;;  %p2318_p12 = scmp.lt.u32.totalorder %s2311_s28, %s3144_s9 }
  0x99   : > { %2038 = dma.hbm_to_vmem [thread:$0]  (!%p3204_p4), %s3140_s5, 1024, %s354_s1, [#allocation12], %s3202_s11, %s3202_s11, %s3201_s7  }
  0x9a   : > { %p2314_p1 = pnand %p2312_p11, %p3203_p8 }
  0x9c   : > { %p2315_p13 = pneg %p2314_p1 }
  0x9e   : > { %p2320_p3 = pnand %p2318_p12, %p2315_p13 }
  0xa0   : > { %2323 = shalt.err (!%p2320_p3)
}
  0xa1   : > { %s2324_s21 = scalar_lea.vmem %s386_s29, 1024  ;;  %p2332_p10 = scmp.lt.s32.totalorder %s386_s29, %s386_s29 }
  0xa2   : > { %p2325_p9 = scmp.ne.s32.totalorder %s386_s29, %s2324_s21  ;;  %p2333_p5 = scmp.lt.s32.totalorder %s2324_s21, %s2324_s21 }
  0xa4   : > { %p2327_p0 = pnand %p2325_p9, %p3203_p8  ;;  %p2334_p7 = por %p2333_p5, %p2332_p10 }
  0xa6   : > { %p2328_p2 = pneg %p2327_p0 }
  0xa8   : > { %p2335_p6 = pnand %p2334_p7, %p2328_p2 }
  0xaa   : > { %2338 = shalt.err (!%p2335_p6)
}
  0xab   : > { %2044 = dma.hbm_to_vmem [thread:$0]  (!%p3204_p4), %s3144_s9, 1024, %s386_s29, [#allocation15], %s3202_s11, %s3202_s11, %s3201_s7  }
  0xac   : > { %s2817_s6 = scalar_lea.hbm %s3135_s0, %s2719_s12  ;;  %s406_s30 = scalar_lea.vmem [#allocation5], %s2716_s13 }
  0xad   : > { %s415_s22 = sshll.u32 %s406_s30, 4  ;;  %s2826_s24 = scalar_lea.hbm %s3137_s2, %s2719_s12  ;;  %s2820_s22 = int_to_ptr.vmem [resolvable:$true] %s415_s22 }
  0xae   : > { %s3205_s15 = sand.u32 1, %s2481_s19   ;;  %s2339_s10 = scalar_lea.hbm %s2817_s6, 128 }
  0xaf   : > { %s2830_s29 = scalar_lea.sflag [#allocation6], %s3205_s15  ;;  %p2340_p6 = scmp.ne.s32.totalorder %s2817_s6, %s2339_s10 }
  0xb0   : > { %p3206_p8 = scmp.ne.s32.totalorder %s3200_s20, 0  ;;  %s2344_s1 = scalar_lea.hbm %s3135_s0, 256 }
  0xb1   : > { %p2345_p1 = scmp.lt.u32.totalorder %s2817_s6, %s3135_s0  ;;  %p2346_p13 = scmp.lt.u32.totalorder %s2344_s1, %s2339_s10 }
  0xb2   : > { %p2342_p4 = pnand %p2340_p6, %p3206_p8  ;;  %p2348_p3 = scmp.lt.u32.totalorder %s2339_s10, %s2817_s6 }
  0xb3   : > { %p2347_p12 = por %p2346_p13, %p2345_p1 }
  0xb4   : > { %p2343_p11 = pneg %p2342_p4 }
  0xb5   : > { %p2349_p9 = por %p2348_p3, %p2347_p12 }
  0xb7   : > { %p2350_p0 = pnand %p2349_p9, %p2343_p11 }
  0xb9   : > { %2353 = shalt.err (!%p2350_p0)
}
  0xba   : > { %s2354_s12 = scalar_lea.vmem %s2820_s22, 128  ;;  %s2502_s4 = smov [#allocation5]  }
  0xbb   : > { %p2355_p2 = scmp.ne.s32.totalorder %s2820_s22, %s2354_s12  ;;  %s2359_s30 = sshll.u32 %s2502_s4, 4  ;;  %s2360_s30 = int_to_ptr.vmem [resolvable:$false] %s2359_s30 }
  0xbc   : > { %s2361_s16 = scalar_lea.vmem %s2360_s30, 256  ;;  %p2362_p7 = scmp.lt.s32.totalorder %s2820_s22, %s2360_s30 }
  0xbd   : > { %p2357_p10 = pnand %p2355_p2, %p3206_p8  ;;  %p2363_p6 = scmp.lt.s32.totalorder %s2361_s16, %s2354_s12 }
  0xbf   : > { %p2358_p5 = pneg %p2357_p10  ;;  %p2364_p4 = por %p2363_p6, %p2362_p7 }
  0xc1   : > { %p2365_p1 = pnand %p2364_p4, %p2358_p5 }
  0xc3   : > { %2368 = shalt.err (!%p2365_p1)
}
  0xc4   : > { %p3207_p11 = scmp.ne.s32.totalorder %s3197_s14, 0  ;;  %s450_s28 = scalar_lea.vmem [#allocation10], %s2716_s13 }
  0xc5   : > { %s457_s15 = sshll.u32 %s450_s28, 4  ;;  %s2369_s10 = scalar_lea.hbm %s2826_s24, 128  ;;  %s2858_s15 = int_to_ptr.vmem [resolvable:$true] %s457_s15 }
  0xc6   : > { %2048 = dma.hbm_to_vmem [thread:$0]  (!%p3207_p11), %s2817_s6, 128, %s2820_s22, %s2830_s29, %s3202_s11, %s3202_s11, %s3201_s7  }
  0xc7   : > { %p2370_p13 = scmp.ne.s32.totalorder %s2826_s24, %s2369_s10  ;;  %s2374_s1 = scalar_lea.hbm %s3137_s2, 256 }
  0xc8   : > { %p2375_p9 = scmp.lt.u32.totalorder %s2826_s24, %s3137_s2  ;;  %p2376_p0 = scmp.lt.u32.totalorder %s2374_s1, %s2369_s10 }
  0xc9   : > { %p2372_p12 = pnand %p2370_p13, %p3206_p8  ;;  %p2378_p10 = scmp.lt.u32.totalorder %s2369_s10, %s2826_s24 }
  0xca   : > { %p2377_p2 = por %p2376_p0, %p2375_p9 }
  0xcb   : > { %p2373_p3 = pneg %p2372_p12 }
  0xcc   : > { %p2379_p5 = por %p2378_p10, %p2377_p2 }
  0xce   : > { %p2380_p7 = pnand %p2379_p5, %p2373_p3 }
  0xd0   : > { %2383 = shalt.err (!%p2380_p7)
}
  0xd1   : > { %s2384_s13 = scalar_lea.vmem %s2858_s15, 128  ;;  %s2503_s6 = smov [#allocation10]  }
  0xd2   : > { %p2385_p6 = scmp.ne.s32.totalorder %s2858_s15, %s2384_s13  ;;  %s2389_s22 = sshll.u32 %s2503_s6, 4  ;;  %s2390_s22 = int_to_ptr.vmem [resolvable:$false] %s2389_s22 }
  0xd3   : > { %s2391_s29 = scalar_lea.vmem %s2390_s22, 256  ;;  %p2392_p13 = scmp.lt.s32.totalorder %s2858_s15, %s2390_s22 }
  0xd4   : > { %p2387_p4 = pnand %p2385_p6, %p3206_p8  ;;  %p2393_p12 = scmp.lt.s32.totalorder %s2391_s29, %s2384_s13 }
  0xd6   : > { %p2388_p1 = pneg %p2387_p4  ;;  %p2394_p9 = por %p2393_p12, %p2392_p13 }
  0xd8   : > { %p2395_p0 = pnand %p2394_p9, %p2388_p1 }
  0xda   : > { %2398 = shalt.err (!%p2395_p0)
}
  0xdb   : > { %2054 = dma.hbm_to_vmem [thread:$0]  (!%p3207_p11), %s2826_s24, 128, %s2858_s15, %s2738_s3, %s3202_s11, %s3202_s11, %s3201_s7  }
  0xdc   : > { %p3208_p8 = scmp.ne.s32.totalorder %s3188_s27, 0 }
  0xdd   : > { %s2888_s20 = sand.u32 (!%p3208_p8), 1, %s2477_s18   ;;  %p3209_p3 = scmp.ne.s32.totalorder (!%p3208_p8), %s3185_s25, 0 }
  0xde   : > { %469 = sbr.rel (%p3208_p8) target bundleno = 2618 (0xa3a), region = 64  ;;  %s2891_s12 = sshll.u32 (!%p3208_p8), %s2888_s20, 3 }
  0xdf   : > { %s472_s14 = scalar_lea.sflag (!%p3208_p8), [#allocation6], %s2888_s20  ;;  %s475_s4 = scalar_lea.vmem (!%p3208_p8), [#allocation5], %s2891_s12 }
  0xe5   : > { %2452 = dma.done.wait (%p3209_p3), %s472_s14, 128  }
  0xe6   : > { %2454 = vsyncadd (%p3209_p3), %s472_s14, 4294967168  ;;  %s480_s3 = sand.u32 1, %s2603_s23   ;;  %s484_s7 = scalar_lea.vmem [#allocation8], %s2891_s12 }
  0xe7   : > { %s481_s27 = scalar_lea.sflag [#allocation9], %s480_s3 }
  0xe8   : > { %2456 = dma.done.wait (%p3209_p3), %s481_s27, 256  }
  0xe9   : > { %2458 = vsyncadd (%p3209_p3), %s481_s27, 4294967040  ;;  %s493_s11 = scalar_lea.vmem [#allocation10], %s2891_s12  ;;  %p3210_p11 = scmp.eq.s32.totalorder %s2603_s23, 0 }
  0xeb   : > { %2460 = dma.done.wait (%p3210_p11), [#allocation12], 2048   ;;  %p3211_p2 = pmov %p3210_p11 }
  0xed   : > { %2462 = vsyncadd (%p3211_p2), [#allocation12], 4294965248  ;;  %p3212_p10 = pmov %p3211_p2 }
  0xee   : > { %p3213_p5 = pmov %p3211_p2 }
  0xef   : > { %2464 = dma.done.wait (%p3212_p10), [#allocation15], 2048  }
  0xf0   : > { %2466 = vsyncadd (%p3213_p5), [#allocation15], 4294965248  ;;  %v2504_v0 = vmov 0.0   ;;  %vm2505_vm0 = vmmov 0   ;;  %v2130_v1 = vld [vmem:[#allocation13] sm:$0xff]   ;;  %v2131_v2 = vld [vmem:[#allocation13 + $0x8] sm:$0xff]  }
  0xf1   : > { %1880 = vmatprep.subr.bf16.mxu0 %v2504_v0  ;;  %1896 = vmatprep.mubr.msk.bf16.mxu0 %vm2505_vm0, %v2504_v0  ;;  %v2132_v3 = vld [vmem:[#allocation13 + $0x10] sm:$0xff]   ;;  %v2133_v4 = vld [vmem:[#allocation13 + $0x18] sm:$0xff]   ;;  %v2134_v5 = vld [vmem:[#allocation13 + $0x20] sm:$0xff]   ;;  %s3214_s24 = sld [smem:[#allocation34_spill]]  ;;  %vm932_vm1 = vcmask 261120   ;;  %s2506_s30 = smov 96  }
  0xf2   : > { %1900 = vmatprep.subr.bf16.mxu1 %v2504_v0  ;;  %1916 = vmatprep.mubr.msk.bf16.mxu1 %vm2505_vm0, %v2504_v0  ;;  %v2135_v6 = vld [vmem:[#allocation13 + $0x28] sm:$0xff]   ;;  %v2148_v7 = vld [vmem:[#allocation14] sm:$0xff]   ;;  %v2136_v9 = vld [vmem:[#allocation13 + $0x30] sm:$0xff]   ;;  %s3215_s15 = sld [smem:[#allocation33_spill]]  ;;  %s3216_s21 = sld [smem:[#allocation36_spill]]  ;;  %vm980_vm2 = vcmask 130048  }
  0xf3   : > { %1881 = vmatpush3.bf16.msra.mxu0 %v2130_v1  ;;  %1901 = vmatpush3.bf16.msra.mxu1 %v2148_v7  ;;  %v2149_v8 = vld [vmem:[#allocation14 + $0x8] sm:$0xff]   ;;  %v2150_v10 = vld [vmem:[#allocation14 + $0x10] sm:$0xff]   ;;  %v2137_v11 = vld [vmem:[#allocation13 + $0x38] sm:$0xff]   ;;  %s2507_s1 = smov 64   ;;  %s2508_s17 = smov 32   ;;  %vm1181_vm3 = vcmask 523520  }
  0xf4   : > { %1882 = vmatprep.subr.bf16.mxu0 %v2504_v0  ;;  %1902 = vmatprep.subr.bf16.mxu1 %v2504_v0  ;;  %v2151_v12 = vld [vmem:[#allocation14 + $0x18] sm:$0xff]   ;;  %v2138_v13 = vld [vmem:[%s484_s7] sm:$0xff]   ;;  %v2141_v18 = vld [vmem:[#allocation11 + $0x10] sm:$0xff]   ;;  %vm1313_vm4 = vcmask 785920   ;;  %s3217_s26 = sld [smem:[#allocation24_spill]]  ;;  %vm1445_vm5 = vcmask 1048320  }
  0xf5   : > { %v2139_v14 = vld [vmem:[#allocation11] sm:$0xff]   ;;  %v2140_v16 = vld [vmem:[#allocation11 + $0x8] sm:$0xff]   ;;  %v2154_v19 = vld [vmem:[#allocation14 + $0x30] sm:$0xff]   ;;  %s1771_s13 = sshll.u32 %s2888_s20, 4  ;;  %s3218_s29 = sld [smem:[#allocation37_spill]] }
  0xf6   : > { %v2152_v15 = vld [vmem:[#allocation14 + $0x20] sm:$0xff]   ;;  %v2153_v17 = vld [vmem:[#allocation14 + $0x28] sm:$0xff]   ;;  %v2142_v20 = vld [vmem:[#allocation11 + $0x18] sm:$0xff]   ;;  %s557_s12 = scalar_lea.vmem [#allocation17], %s1771_s13  ;;  %s3219_s14 = sld [smem:[#allocation29_spill]] }
  0xf7   : > { %1883 = vmatpush3.bf16.msra.mxu0 %v2131_v2  ;;  %1903 = vmatpush3.bf16.msra.mxu1 %v2149_v8  ;;  %v2155_v21 = vld [vmem:[#allocation14 + $0x38] sm:$0xff]   ;;  %v2143_v22 = vld [vmem:[#allocation11 + $0x20] sm:$0xff]   ;;  %v2144_v23 = vld [vmem:[#allocation11 + $0x28] sm:$0xff]   ;;  %s1563_s25 = scalar_lea.sflag [#allocation7], %s2888_s20 }
  0xf8   : > { %1884 = vmatprep.subr.bf16.mxu0 %v2504_v0  ;;  %1904 = vmatprep.subr.bf16.mxu1 %v2504_v0  ;;  %v2145_v24 = vld [vmem:[#allocation11 + $0x30] sm:$0xff]   ;;  %v2146_v25 = vld [vmem:[#allocation11 + $0x38] sm:$0xff]   ;;  %v1772_v28 = vld [vmem:[%s3214_s24] ss:$0 sm:$0xff] }
  0xf9   : > { %v2147_v26 = vld [vmem:[%s475_s4] sm:$0xff]   ;;  %v1792_v37 = vld [vmem:[%s3215_s15] ss:$0 sm:$0xff]  ;;  %s1578_s4 = sshll.u32 %s557_s12, 4  ;;  %s3081_s4 = int_to_ptr.vmem [resolvable:$true] %s1578_s4 }
  0xfa   : > { %v2156_v27 = vld [vmem:[%s493_s11] sm:$0xff]   ;;  %v1782_v45 = vld [vmem:[%s3216_s21] ss:$0 sm:$0xff]  ;;  %s1827_s3 = sshll.u32 %s3217_s26, 8  ;;  %s3220_s11 = sld [smem:[#allocation38_spill]] }
  0xfb   : > { %1885 = vmatpush3.bf16.msra.mxu0 %v2132_v3  ;;  %1905 = vmatpush3.bf16.msra.mxu1 %v2150_v10  ;;  %s2399_s24 = scalar_lea.vmem %s3081_s4, 256 }
  0xfc   : > { %1886 = vmatprep.subr.bf16.mxu0 %v2504_v0  ;;  %1906 = vmatprep.subr.bf16.mxu1 %v2504_v0  ;;  %p2400_p7 = scmp.ne.s32.totalorder %s3081_s4, %s2399_s24  ;;  %p3221_p6 = scmp.ne.s32.totalorder %s3219_s14, 0 }
  0xfe   : > { %p2401_p4 = pnand %p2400_p7, %p3221_p6 }
  0xff   : > { %1887 = vmatpush3.bf16.msra.mxu0 %v2133_v4  ;;  %1907 = vmatpush3.bf16.msra.mxu1 %v2151_v12 }
 0x100   : > { %1888 = vmatprep.subr.bf16.mxu0 %v2504_v0  ;;  %1908 = vmatprep.subr.bf16.mxu1 %v2504_v0  ;;  %s3086_s23 = scalar_lea.hbm %s3220_s11, %s1827_s3  ;;  %p2402_p1 = pneg %p2401_p4 }
 0x103   : > { %1889 = vmatpush3.bf16.msra.mxu0 %v2134_v5  ;;  %1909 = vmatpush3.bf16.msra.mxu1 %v2152_v15 }
 0x104   : > { %1890 = vmatprep.subr.bf16.mxu0 %v2504_v0  ;;  %1910 = vmatprep.subr.bf16.mxu1 %v2504_v0 }
 0x107   : > { %1891 = vmatpush3.bf16.msra.mxu0 %v2135_v6  ;;  %1911 = vmatpush3.bf16.msra.mxu1 %v2153_v17 }
 0x108   : > { %1892 = vmatprep.subr.bf16.mxu0 %v2504_v0  ;;  %1912 = vmatprep.subr.bf16.mxu1 %v2504_v0 }
 0x10b   : > { %1893 = vmatpush3.bf16.msra.mxu0 %v2136_v9  ;;  %1913 = vmatpush3.bf16.msra.mxu1 %v2154_v19 }
 0x10c   : > { %1894 = vmatprep.subr.bf16.mxu0 %v2504_v0  ;;  %1914 = vmatprep.subr.bf16.mxu1 %v2504_v0 }
 0x10f   : > { %1895 = vmatpush3.bf16.msra.mxu0 %v2137_v11  ;;  %1915 = vmatpush3.bf16.msra.mxu1 %v2155_v21 }
 0x110   : > { %1920 = vmatprep.subr.bf16.mxu0 %v2504_v0  ;;  %1940 = vmatprep.subr.bf16.mxu1 %v2504_v0 }
 0x112   : > { %1897 = vmatmul.mubr.bf16.vlgmr.msra.gmra.mrb[0].mxu0 %v2138_v13  ;;  %1917 = vmatmul.mubr.bf16.vlgmr.msra.gmra.mrb[0].mxu1 %v2156_v27 }
 0x113   : > { %1921 = vmatpush3.bf16.msra.mxu0 %v2139_v14  ;;  %1936 = vmatprep.mubr.msk.bf16.mxu0 %vm2505_vm0, %v2504_v0 }
 0x114   : > { %1922 = vmatprep.subr.bf16.mxu0 %v2504_v0  ;;  %1942 = vmatprep.mubr.msk.bf16.mxu1 %vm2505_vm0, %v2504_v0 }
 0x117   : > { %1923 = vmatpush3.bf16.msra.mxu0 %v2140_v16 }
 0x118   : > { %1924 = vmatprep.subr.bf16.mxu0 %v2504_v0 }
 0x11b   : > { %1925 = vmatpush3.bf16.msra.mxu0 %v2141_v18 }
 0x11c   : > { %1926 = vmatprep.subr.bf16.mxu0 %v2504_v0 }
 0x11f   : > { %1927 = vmatpush3.bf16.msra.mxu0 %v2142_v20 }
 0x120   : > { %1928 = vmatprep.subr.bf16.mxu0 %v2504_v0 }
 0x123   : > { %1929 = vmatpush3.bf16.msra.mxu0 %v2143_v22 }
 0x124   : > { %1930 = vmatprep.subr.bf16.mxu0 %v2504_v0 }
 0x127   : > { %1931 = vmatpush3.bf16.msra.mxu0 %v2144_v23 }
 0x128   : > { %1932 = vmatprep.subr.bf16.mxu0 %v2504_v0 }
 0x12b   : > { %1933 = vmatpush3.bf16.msra.mxu0 %v2145_v24 }
 0x12c   : > { %1934 = vmatprep.subr.bf16.mxu0 %v2504_v0 }
 0x12f   : > { %1935 = vmatpush3.bf16.msra.mxu0 %v2146_v25 }
 0x130   : > { %1988 = vmatprep.subr.bf16.mxu0 %v2504_v0 }
 0x132   : > { %1937 = vmatmul.mubr.bf16.vlgmr.msra.gmra.mrb[4].mxu0 %v2147_v26 }
 0x133   : > { %2004 = vmatprep.mubr.msk.bf16.mxu0 %vm2505_vm0, %v2504_v0 }
 0x1e5   : > { %v680_v29 = vpop.f32.mrb[0].mxu0  ;;  %v800_v46 = vpop.f32.mrb[0].mxu1 }
 0x1e6   : > { %v681_v30 = vadd.f32 %v1772_v28, %v680_v29  ;;  %v1898_v31 = vpop.f32.mrb[1].mxu0  ;;  %v801_v47 = vadd.f32 %v1782_v45, %v800_v46  ;;  %v1918_v48 = vpop.f32.mrb[1].mxu1 }
 0x1e7   : > { %v683_v32 = vpop.f32.mrb[2].mxu0  ;;  %v803_v49 = vpop.f32.mrb[2].mxu1 }
 0x1e8   : > { %v684_v33 = vadd.f32 %v1772_v28, %v683_v32  ;;  %v1899_v34 = vpop.f32.mrb[3].mxu0  ;;  %v804_v50 = vadd.f32 %v1782_v45, %v803_v49  ;;  %v1919_v51 = vpop.f32.mrb[3].mxu1 }
 0x1ea   : > { %v2959_v35 = vpack.c.bf16 %v684_v33, %v681_v30  ;;  %v2980_v52 = vpack.c.bf16 %v804_v50, %v801_v47 }
 0x1ec   : > { %1056 = vrot.lane.b32.xlu1 %v2959_v35, %s2506_s30  ;;  %v937_v36 = vsel %vm932_vm1, %v2959_v35, 0 }
 0x1ed   : > { %1941 = vmatpush3.bf16.xpose.msra.mxu1 %v937_v36 }
 0x1ee   : > { %1946 = vmatprep.subr.bf16.mxu1 %v2504_v0 }
 0x205   : > { %v922_v38 = vpop.f32.mrb[4].mxu0 }
 0x206   : > { %v1938_v39 = vpop.f32.mrb[5].mxu0  ;;  %v923_v41 = vadd.f32 %v1792_v37, %v922_v38 }
 0x207   : > { %v925_v40 = vpop.f32.mrb[6].mxu0 }
 0x208   : > { %v926_v42 = vadd.f32 %v1792_v37, %v925_v40  ;;  %v1939_v43 = vpop.f32.mrb[7].mxu0 }
 0x20a   : > { %v2969_v44 = vpack.c.bf16 %v926_v42, %v923_v41 }
 0x20c   : > { %1053 = vrot.lane.b32.xlu1 %v2969_v44, %s2506_s30  ;;  %1943 = vmatmul.mubr.msk.bf16.vlgmr.msra.gmra.mrb[4].mxu1 %vm932_vm1, %v2969_v44 }
 0x20d   : > { %1948 = vmatprep.mubr.msk.bf16.mxu1 %vm2505_vm0, %v2504_v0  ;;  %1947 = vmatpush3.bf16.msra.mxu1 %v2980_v52 }
 0x20e   : > { %1952 = vmatprep.subr.bf16.mxu1 %v2504_v0 }
 0x25e   : > { %v1057_v4 = vpop.permute.xlu1 %1056 }
 0x25f   : > { %v1062_v6 = vsel %vm932_vm1, %v1057_v4, 0 }
 0x27e   : > { %v1054_v7 = vpop.permute.xlu1 %1053 }
 0x2df   : > { %v973_v53 = vpop.f32.mrb[4].mxu1 }
 0x2e0   : > { %v1944_v54 = vpop.f32.mrb[5].mxu1  ;;  %v981_v55 = vsel %vm980_vm2, %v973_v53, -inf }
 0x2e1   : > { %982 = vmax.xlane.f32.xlu0 %v981_v55  ;;  %v976_v56 = vpop.f32.mrb[6].mxu1 }
 0x2e2   : > { %v1945_v57 = vpop.f32.mrb[7].mxu1  ;;  %v984_v58 = vsel %vm980_vm2, %v976_v56, -inf }
 0x2e5   : > { %985 = vmax.xlane.f32.xlu0 %v984_v58 }
 0x36e   : > { %v983_v59 = vpop.xlane.xlu0 %982 }
 0x36f   : > { %v987_v60 = vsub.f32 %v973_v53, %v983_v59 }
 0x371   : > { %v989_v61 = vmul.f32 1.442695, %v987_v60 }
 0x372   : > { %v986_v62 = vpop.xlane.xlu0 %985 }
 0x373   : > { %v988_v63 = vsub.f32 %v976_v56, %v986_v62  ;;  %2165 = vpow2.f32 %v989_v61 }
 0x375   : > { %v991_v1 = vmul.f32 1.442695, %v988_v63 }
 0x377   : > { %2167 = vpow2.f32 %v991_v1 }
 0x37d   : > { %v2986_v2 = vpop.eup %2165 }
 0x381   : > { %v2988_v3 = vpop.eup %2167 }
 0x382   : > { %v999_v5 = vpack.c.bf16 %v2988_v3, %v2986_v2 }
 0x384   : > { %1949 = vmatmul.mubr.msk.bf16.vlgmr.msra.gmra.mrb[8].mxu1 %vm980_vm2, %v999_v5 }
 0x385   : > { %1953 = vmatpush3.bf16.xpose.msra.mxu1 %v1062_v6  ;;  %1954 = vmatprep.mubr.msk.bf16.mxu1 %vm2505_vm0, %v2504_v0 }
 0x386   : > { %1958 = vmatprep.subr.bf16.mxu1 %v2504_v0 }
 0x38c   : > { %1955 = vmatmul.mubr.msk.bf16.vlgmr.msra.gmra.mrb[12].mxu1 %vm932_vm1, %v1054_v7 }
 0x38d   : > { %1960 = vmatprep.mubr.msk.bf16.mxu1 %vm2505_vm0, %v2504_v0 }
 0x457   : > { %v3000_v8 = vpop.f32.mrb[8].mxu1 }
 0x458   : > { %v1950_v9 = vpop.f32.mrb[9].mxu1 }
 0x459   : > { %v3002_v10 = vpop.f32.mrb[10].mxu1  ;;  %v996_v9 = vsel %vm980_vm2, %v2988_v3, 0.0 }
 0x45a   : > { %v1951_v11 = vpop.f32.mrb[11].mxu1 }
 0x45f   : > { %v1098_v12 = vpop.f32.mrb[12].mxu1 }
 0x460   : > { %v1956_v13 = vpop.f32.mrb[13].mxu1  ;;  %v1105_v14 = vsel %vm980_vm2, %v1098_v12, -inf }
 0x461   : > { %1106 = vmax.xlane.f32.xlu0 %v1105_v14  ;;  %v1101_v15 = vpop.f32.mrb[14].mxu1 }
 0x462   : > { %v1957_v16 = vpop.f32.mrb[15].mxu1  ;;  %v1108_v17 = vsel %vm980_vm2, %v1101_v15, -inf }
 0x463   : > { %1109 = vmax.xlane.f32.xlu1 %v1108_v17 }
 0x474   : > { %1257 = vrot.lane.b32.xlu1 %v2980_v52, %s2507_s1 }
 0x477   : > { %1125 = vrot.lane.b32.xlu0 %v2980_v52, %s2506_s30 }
 0x47b   : > { %1188 = vrot.lane.b32.xlu0 %v2959_v35, %s2507_s1 }
 0x47f   : > { %1185 = vrot.lane.b32.xlu0 %v2969_v44, %s2507_s1 }
 0x4ee   : > { %v1107_v18 = vpop.xlane.xlu0 %1106 }
 0x4ef   : > { %v1111_v19 = vsub.f32 %v1098_v12, %v1107_v18 }
 0x4f0   : > { %v1110_v20 = vpop.xlane.xlu1 %1109 }
 0x4f1   : > { %v1113_v21 = vmul.f32 1.442695, %v1111_v19  ;;  %v1112_v22 = vsub.f32 %v1101_v15, %v1110_v20 }
 0x4f2   : > { %v1126_v23 = vpop.permute.xlu0 %1125 }
 0x4f3   : > { %v1115_v24 = vmul.f32 1.442695, %v1112_v22  ;;  %1959 = vmatpush3.bf16.msra.mxu1 %v1126_v23  ;;  %2169 = vpow2.f32 %v1113_v21 }
 0x4f4   : > { %1964 = vmatprep.subr.bf16.mxu1 %v2504_v0  ;;  %v1258_v31 = vpop.permute.xlu1 %1257 }
 0x4f5   : > { %2171 = vpow2.f32 %v1115_v24 }
 0x4f6   : > { %v1189_v27 = vpop.permute.xlu0 %1188 }
 0x4f7   : > { %v1194_v29 = vsel %vm932_vm1, %v1189_v27, 0 }
 0x4fa   : > { %v1186_v30 = vpop.permute.xlu0 %1185 }
 0x4fd   : > { %v3015_v25 = vpop.eup %2169 }
 0x4fe   : > { %v1117_v7 = vsel %vm980_vm2, %v3015_v25, 0.0 }
 0x4ff   : > { %v2172_v26 = vpop.eup %2171 }
 0x500   : > { %v1123_v28 = vpack.c.bf16 %v2172_v26, %v3015_v25  ;;  %v1120_v4 = vsel %vm980_vm2, %v2172_v26, 0.0  ;;  %v993_v25 = vsel %vm980_vm2, %v2986_v2, 0.0  ;;  %v2157_v2 = vld [vmem:[#allocation16] sm:$0xff]  }
 0x501   : > { %1989 = vmatpush3.bf16.msra.mxu0 %v2157_v2 }
 0x502   : > { %1961 = vmatmul.mubr.msk.bf16.vlgmr.msra.gmra.mrb[16].mxu1 %vm980_vm2, %v1123_v28  ;;  %1990 = vmatprep.subr.bf16.mxu0 %v2504_v0 }
 0x503   : > { %1965 = vmatpush3.bf16.xpose.msra.mxu1 %v1194_v29  ;;  %1966 = vmatprep.mubr.msk.bf16.mxu1 %vm2505_vm0, %v2504_v0 }
 0x504   : > { %1970 = vmatprep.subr.bf16.mxu1 %v2504_v0 }
 0x50a   : > { %1967 = vmatmul.mubr.msk.bf16.vlgmr.msra.gmra.mrb[20].mxu1 %vm932_vm1, %v1186_v30 }
 0x50b   : > { %1971 = vmatpush3.bf16.msra.mxu1 %v1258_v31  ;;  %1972 = vmatprep.mubr.msk.bf16.mxu1 %vm2505_vm0, %v2504_v0 }
 0x50c   : > { %1976 = vmatprep.subr.bf16.mxu1 %v2504_v0 }
 0x5d5   : > { %v3027_v32 = vpop.f32.mrb[16].mxu1 }
 0x5d6   : > { %v1962_v33 = vpop.f32.mrb[17].mxu1 }
 0x5d7   : > { %v3029_v34 = vpop.f32.mrb[18].mxu1 }
 0x5d8   : > { %v1963_v36 = vpop.f32.mrb[19].mxu1 }
 0x5dd   : > { %v1230_v37 = vpop.f32.mrb[20].mxu1 }
 0x5de   : > { %v1968_v38 = vpop.f32.mrb[21].mxu1  ;;  %v1237_v39 = vsel %vm980_vm2, %v1230_v37, -inf }
 0x5df   : > { %1238 = vmax.xlane.f32.xlu0 %v1237_v39  ;;  %v1233_v40 = vpop.f32.mrb[22].mxu1  ;;  %v2158_v39 = vld [vmem:[#allocation16 + $0x8] sm:$0xff]  }
 0x5e0   : > { %v1969_v41 = vpop.f32.mrb[23].mxu1  ;;  %v1240_v42 = vsel %vm980_vm2, %v1233_v40, -inf  ;;  %1991 = vmatpush3.bf16.msra.mxu0 %v2158_v39 }
 0x5e1   : > { %1241 = vmax.xlane.f32.xlu1 %v1240_v42  ;;  %1992 = vmatprep.subr.bf16.mxu0 %v2504_v0  ;;  %v2160_v41 = vld [vmem:[#allocation16 + $0x18] sm:$0xff]  }
 0x5f2   : > { %1320 = vrot.lane.b32.xlu1 %v2959_v35, %s2508_s17 }
 0x5f6   : > { %1317 = vrot.lane.b32.xlu1 %v2969_v44, %s2508_s17 }
 0x66c   : > { %v1239_v43 = vpop.xlane.xlu0 %1238 }
 0x66d   : > { %v1243_v45 = vsub.f32 %v1230_v37, %v1239_v43 }
 0x66e   : > { %v1242_v46 = vpop.xlane.xlu1 %1241 }
 0x66f   : > { %v1245_v47 = vmul.f32 1.442695, %v1243_v45  ;;  %v1244_v48 = vsub.f32 %v1233_v40, %v1242_v46  ;;  %v2159_v40 = vld [vmem:[#allocation16 + $0x10] sm:$0xff]  }
 0x670   : > { %1993 = vmatpush3.bf16.msra.mxu0 %v2159_v40 }
 0x671   : > { %v1247_v49 = vmul.f32 1.442695, %v1244_v48  ;;  %2173 = vpow2.f32 %v1245_v47  ;;  %1994 = vmatprep.subr.bf16.mxu0 %v2504_v0 }
 0x672   : > { %v1321_v53 = vpop.permute.xlu1 %1320 }
 0x673   : > { %2175 = vpow2.f32 %v1247_v49  ;;  %v1326_v55 = vsel %vm932_vm1, %v1321_v53, 0 }
 0x674   : > { %1995 = vmatpush3.bf16.msra.mxu0 %v2160_v41 }
 0x675   : > { %1996 = vmatprep.subr.bf16.mxu0 %v2504_v0 }
 0x676   : > { %v1318_v35 = vpop.permute.xlu1 %1317 }
 0x67b   : > { %v2174_v50 = vpop.eup %2173 }
 0x67c   : > { %v1249_v5 = vsel %vm980_vm2, %v2174_v50, 0.0 }
 0x67d   : > { %v2176_v51 = vpop.eup %2175 }
 0x67e   : > { %v1255_v54 = vpack.c.bf16 %v2176_v51, %v2174_v50  ;;  %v1252_v6 = vsel %vm980_vm2, %v2176_v51, 0.0 }
 0x680   : > { %1973 = vmatmul.mubr.msk.bf16.vlgmr.msra.gmra.mrb[24].mxu1 %vm980_vm2, %v1255_v54 }
 0x681   : > { %1977 = vmatpush3.bf16.xpose.msra.mxu1 %v1326_v55  ;;  %1978 = vmatprep.mubr.msk.bf16.mxu1 %vm2505_vm0, %v2504_v0  ;;  %v2163_v55 = vld [vmem:[#allocation16 + $0x30] sm:$0xff]  }
 0x682   : > { %1982 = vmatprep.subr.bf16.mxu1 %v2504_v0 }
 0x688   : > { %1979 = vmatmul.mubr.msk.bf16.vlgmr.msra.gmra.mrb[28].mxu1 %vm932_vm1, %v1318_v35  ;;  %v2164_v35 = vld [vmem:[#allocation16 + $0x38] sm:$0xff]  }
 0x689   : > { %1984 = vmatprep.mubr.msk.bf16.mxu1 %vm2505_vm0, %v2504_v0 }
 0x753   : > { %v1297_v44 = vpop.f32.mrb[24].mxu1 }
 0x754   : > { %v1974_v56 = vpop.f32.mrb[25].mxu1 }
 0x755   : > { %v1300_v57 = vpop.f32.mrb[26].mxu1 }
 0x756   : > { %v1975_v58 = vpop.f32.mrb[27].mxu1 }
 0x75b   : > { %v1362_v59 = vpop.f32.mrb[28].mxu1 }
 0x75c   : > { %v1980_v60 = vpop.f32.mrb[29].mxu1  ;;  %v1369_v61 = vsel %vm980_vm2, %v1362_v59, -inf }
 0x75d   : > { %1370 = vmax.xlane.f32.xlu0 %v1369_v61  ;;  %v1365_v62 = vpop.f32.mrb[30].mxu1 }
 0x75e   : > { %v1981_v63 = vpop.f32.mrb[31].mxu1  ;;  %v1372_v1 = vsel %vm980_vm2, %v1365_v62, -inf }
 0x75f   : > { %1373 = vmax.xlane.f32.xlu1 %v1372_v1 }
 0x763   : > { %1121 = vadd.xlane.f32.xlu1 %v1120_v4 }
 0x767   : > { %1250 = vadd.xlane.f32.xlu1 %v1249_v5 }
 0x76b   : > { %1253 = vadd.xlane.f32.xlu1 %v1252_v6 }
 0x773   : > { %1389 = vrot.lane.b32.xlu0 %v2980_v52, %s2508_s17 }
 0x792   : > { %1118 = vadd.xlane.f32.xlu0 %v1117_v7 }
 0x796   : > { %997 = vadd.xlane.f32.xlu0 %v996_v9 }
 0x7ea   : > { %v1371_v11 = vpop.xlane.xlu0 %1370 }
 0x7eb   : > { %v1375_v12 = vsub.f32 %v1362_v59, %v1371_v11 }
 0x7ec   : > { %v1374_v13 = vpop.xlane.xlu1 %1373 }
 0x7ed   : > { %v1377_v14 = vmul.f32 1.442695, %v1375_v12  ;;  %v1376_v15 = vsub.f32 %v1365_v62, %v1374_v13 }
 0x7ee   : > { %v1390_v16 = vpop.permute.xlu0 %1389 }
 0x7ef   : > { %2177 = vpow2.f32 %v1377_v14  ;;  %v1379_v17 = vmul.f32 1.442695, %v1376_v15  ;;  %1983 = vmatpush3.bf16.msra.mxu1 %v1390_v16 }
 0x7f0   : > { %v1122_v18 = vpop.xlane.xlu1 %1121 }
 0x7f1   : > { %2179 = vpow2.f32 %v1379_v17 }
 0x7f4   : > { %v1251_v52 = vpop.xlane.xlu1 %1250 }
 0x7f5   : > { %2181 = vrcp.f32 %v1251_v52 }
 0x7f8   : > { %v1254_v19 = vpop.xlane.xlu1 %1253 }
 0x7f9   : > { %v2178_v20 = vpop.eup %2177  ;;  %2183 = vrcp.f32 %v1254_v19 }
 0x7fa   : > { %v1381_v21 = vsel %vm980_vm2, %v2178_v20, 0.0  ;;  %2185 = vrcp.f32 %v1122_v18 }
 0x7fb   : > { %v2180_v3 = vpop.eup %2179  ;;  %1382 = vadd.xlane.f32.xlu1 %v1381_v21 }
 0x7fc   : > { %v1387_v22 = vpack.c.bf16 %v2180_v3, %v2178_v20  ;;  %v1384_v23 = vsel %vm980_vm2, %v2180_v3, 0.0 }
 0x7fe   : > { %1985 = vmatmul.mubr.msk.bf16.vlgmr.msra.gmra.mrb[32].mxu1 %vm980_vm2, %v1387_v22 }
 0x7ff   : > { %1385 = vadd.xlane.f32.xlu1 %v1384_v23  ;;  %v2182_v24 = vpop.eup %2181 }
 0x800   : > { %v1306_v27 = vmul.f32 %v2182_v24, %v1297_v44 }
 0x803   : > { %v2184_v26 = vpop.eup %2183  ;;  %994 = vadd.xlane.f32.xlu1 %v993_v25 }
 0x804   : > { %v1307_v28 = vmul.f32 %v2184_v26, %v1300_v57  ;;  %v2186_v31 = vpop.eup %2185 }
 0x805   : > { %v1175_v37 = vmul.f32 %v2186_v31, %v3029_v34  ;;  %v2162_v34 = vld [vmem:[#allocation16 + $0x28] sm:$0xff]  }
 0x806   : > { %v1308_v29 = vpack.c.bf16 %v1307_v28, %v1306_v27 }
 0x808   : > { %1310 = vrot.lane.b32.xlu0 %v1308_v29, %s2507_s1 }
 0x81f   : > { %v1119_v30 = vpop.xlane.xlu0 %1118 }
 0x820   : > { %2187 = vrcp.f32 %v1119_v30 }
 0x823   : > { %v998_v43 = vpop.xlane.xlu0 %997 }
 0x824   : > { %2189 = vrcp.f32 %v998_v43 }
 0x82a   : > { %v2188_v33 = vpop.eup %2187 }
 0x82b   : > { %v1174_v36 = vmul.f32 %v2188_v33, %v3027_v32  ;;  %v2161_v32 = vld [vmem:[#allocation16 + $0x20] sm:$0xff]  }
 0x82c   : > { %1997 = vmatpush3.bf16.msra.mxu0 %v2161_v32 }
 0x82d   : > { %v1176_v38 = vpack.c.bf16 %v1175_v37, %v1174_v36  ;;  %1998 = vmatprep.subr.bf16.mxu0 %v2504_v0 }
 0x82e   : > { %v2190_v47 = vpop.eup %2189 }
 0x82f   : > { %1178 = vrot.lane.b32.xlu1 %v1176_v38, %s2508_s17  ;;  %v1047_v49 = vmul.f32 %v2190_v47, %v3002_v10 }
 0x830   : > { %1999 = vmatpush3.bf16.msra.mxu0 %v2162_v34 }
 0x831   : > { %2000 = vmatprep.subr.bf16.mxu0 %v2504_v0 }
 0x834   : > { %2001 = vmatpush3.bf16.msra.mxu0 %v2163_v55 }
 0x835   : > { %2002 = vmatprep.subr.bf16.mxu0 %v2504_v0  ;;  %v1810_v0 = vld [vmem:[%s3218_s29] ss:$0 sm:$0xff] }
 0x838   : > { %2003 = vmatpush3.bf16.msra.mxu0 %v2164_v35 }
 0x87a   : > { %v1311_v54 = vpop.permute.xlu0 %1310 }
 0x888   : > { %v1383_v42 = vpop.xlane.xlu1 %1382 }
 0x88c   : > { %v1386_v45 = vpop.xlane.xlu1 %1385 }
 0x890   : > { %v995_v46 = vpop.xlane.xlu1 %994 }
 0x891   : > { %2191 = vrcp.f32 %v995_v46 }
 0x892   : > { %2193 = vrcp.f32 %v1383_v42 }
 0x893   : > { %2195 = vrcp.f32 %v1386_v45 }
 0x89b   : > { %v2192_v48 = vpop.eup %2191 }
 0x89c   : > { %v1046_v50 = vmul.f32 %v2192_v48, %v3000_v8  ;;  %v2194_v44 = vpop.eup %2193 }
 0x89d   : > { %v2196_v57 = vpop.eup %2195 }
 0x89e   : > { %v1048_v51 = vpack.c.bf16 %v1047_v49, %v1046_v50 }
 0x8a0   : > { %1049 = vst.msk [vmem:[#allocation4] sm:$0xff] %vm932_vm1, %v1048_v51 }
 0x8a1   : > { %v1179_v53 = vpop.permute.xlu1 %1178 }
 0x8a2   : > { %1182 = vst.msk [vmem:[#allocation4] sm:$0xff] %vm1181_vm3, %v1179_v53 }
 0x8a3   : > { %1314 = vst.msk [vmem:[#allocation4] sm:$0xff] %vm1313_vm4, %v1311_v54 }
 0x8d1   : > { %v1429_v10 = vpop.f32.mrb[32].mxu1 }
 0x8d2   : > { %v1438_v8 = vmul.f32 %v2194_v44, %v1429_v10  ;;  %v1986_v56 = vpop.f32.mrb[33].mxu1 }
 0x8d3   : > { %v1432_v58 = vpop.f32.mrb[34].mxu1 }
 0x8d4   : > { %v1439_v59 = vmul.f32 %v2196_v57, %v1432_v58  ;;  %v1987_v60 = vpop.f32.mrb[35].mxu1 }
 0x8d6   : > { %v1440_v61 = vpack.c.bf16 %v1439_v59, %v1438_v8 }
 0x8d8   : > { %1442 = vrot.lane.b32.xlu1 %v1440_v61, %s2506_s30  ;;  %s2509_s30 = smov [#allocation17]  }
 0x8d9   : > { %s2403_s16 = sshll.u32 %s2509_s30, 4  ;;  %s2404_s16 = int_to_ptr.vmem [resolvable:$false] %s2403_s16 }
 0x8da   : > { %s2405_s28 = scalar_lea.vmem %s2404_s16, 512  ;;  %p2406_p13 = scmp.lt.s32.totalorder %s3081_s4, %s2404_s16 }
 0x8db   : > { %p2407_p12 = scmp.lt.s32.totalorder %s2405_s28, %s2399_s24 }
 0x8dd   : > { %p2408_p9 = por %p2407_p12, %p2406_p13 }
 0x8df   : > { %p2409_p0 = pnand %p2408_p9, %p2402_p1 }
 0x94a   : > { %v1443_v62 = vpop.permute.xlu1 %1442 }
 0x94b   : > { %1446 = vst.msk [vmem:[#allocation4] sm:$0xff] %vm1445_vm5, %v1443_v62 }
 0x952   : > { %v1447_v63 = vld [vmem:[#allocation4] sm:$0xff] }
 0x953   : > { %2005 = vmatmul.mubr.bf16.vlgmr.msra.gmra.mrb[8].mxu0 %v1447_v63 }
 0xa26   : > { %v1553_v1 = vpop.f32.mrb[8].mxu0 }
 0xa27   : > { %v1554_v4 = vadd.f32 %v1810_v0, %v1553_v1  ;;  %v2006_v5 = vpop.f32.mrb[9].mxu0 }
 0xa28   : > { %v1556_v6 = vpop.f32.mrb[10].mxu0 }
 0xa29   : > { %1560 = vst [vmem:[%s557_s12] sm:$0xff] %v1554_v4  ;;  %v1557_v7 = vadd.f32 %v1810_v0, %v1556_v6  ;;  %v2007_v9 = vpop.f32.mrb[11].mxu0 }
 0xa2b   : > { %1561 = vst [vmem:[%s557_s12 + $0x8] sm:$0xff] %v1557_v7 }
 0xa2c   : > { %2412 = shalt.err (!%p2409_p0)
}
 0xa2d   : > { %s2413_s15 = scalar_lea.hbm %s3086_s23, 256  ;;  %s2417_s21 = scalar_lea.hbm %s3220_s11, 512 }
 0xa2e   : > { %p2414_p8 = scmp.ne.s32.totalorder %s3086_s23, %s2413_s15  ;;  %p2418_p2 = scmp.lt.u32.totalorder %s3086_s23, %s3220_s11 }
 0xa2f   : > { %p2419_p10 = scmp.lt.u32.totalorder %s2417_s21, %s2413_s15  ;;  %p2421_p7 = scmp.lt.u32.totalorder %s2413_s15, %s3086_s23 }
 0xa30   : > { %p2415_p3 = pnand %p2414_p8, %p3221_p6 }
 0xa31   : > { %p2420_p5 = por %p2419_p10, %p2418_p2 }
 0xa32   : > { %p2416_p11 = pneg %p2415_p3 }
 0xa33   : > { %p2422_p4 = por %p2421_p7, %p2420_p5 }
 0xa35   : > { %p2423_p1 = pnand %p2422_p4, %p2416_p11 }
 0xa37   : > { %2426 = shalt.err (!%p2423_p1)
}
 0xa38   : > { %s2510_s26 = smov 128   ;;  %s2511_s13 = smov 8  }
 0xa39   : > { %2030 = dma.vmem_to_hbm [thread:$0]  (%p3221_p6), %s3081_s4, 256, %s3086_s23, %s1563_s25, %s2510_s26, %s2510_s26, %s2511_s13  }
 0xa3a PF: > { %s3222_s6 = sld [smem:[#allocation23_spill]]  ;;  %s3223_s22 = sld [smem:[#allocation27_spill]] }
 0xa3b   : > { %s3224_s29 = sld [smem:[#allocation26_spill]] }
 0xa40   : > { %s1593_s12 = sand.u32 1, %s3222_s6   ;;  %p3225_p13 = scmp.ne.s32.totalorder %s3223_s22, 0 }
 0xa41   : > { %p3226_p12 = scmp.ge.s32.totalorder %s3224_s29, 2  ;;  %s1594_s3 = scalar_lea.sflag [#allocation7], %s1593_s12 }
 0xa43   : > { %p2056_p9 = pnand %p3226_p12, %p3225_p13 }
 0xa45   : > { %2468 = dma.done.wait (!%p2056_p9), %s1594_s3, 256  }
 0xa46   : > { %2470 = vsyncadd (!%p2056_p9), %s1594_s3, 4294967040  ;;  %s32_s22 = sadd.s32 1, %s3224_s29   ;;  %s3227_s27 = sld [smem:[#allocation30_spill]] }
 0xa47   : > { %p29_p0 = scmp.ge.s32.totalorder %s32_s22, 4   ;;  %s3228_s20 = sld [smem:[#allocation25_spill]] }
 0xa48   : > { %s3229_s21 = sld [smem:[#allocation28_spill]]  ;;  %s3230_s17 = smov %s2477_s18 }
 0xa49   : > { %s3231_s18 = smov %s2481_s19  ;;  %31 = sbr.rel (!%p29_p0) target bundleno = 19 (0x13), region = 153 }
 0xa4c   : > { %s3232_s19 = smov %s3227_s27 }
 0xa50   :  { %1599 = vsyncpa [#allocation6], 1 }
 0xa51   :  { %1601 = vsyncpa [#allocation6 + $0x1], 1 }
 0xa52   :  { %1602 = vsyncpa [#allocation9], 1 }
 0xa53   :  { %1604 = vsyncpa [#allocation9 + $0x1], 1 }
 0xa54   :  { %1605 = vsyncpa [#allocation12], 1 }
 0xa55   :  { %1606 = vsyncpa [#allocation15], 1 }
 0xa56   :  { %1607 = vsyncpa [#allocation7], 1 }
 0xa57   :  { %1609 = vsyncpa [#allocation7 + $0x1], 1 }

</bundles_post_ra>
